<compile_context>
chip_gen: v5e
topology: v5e:2x2
jax: 0.10.0
libtpu: 0.0.40
codegen_flags: <defaults>
</compile_context>

<pallas_src>
import numpy as np
import jax
import jax.numpy as jnp
from jax.experimental import pallas as pl
from jax.experimental.pallas import tpu as pltpu

NEG_SLOPE = 0.2
NEG_INF = -1e30
MXU_DTYPE = jnp.bfloat16      # matmul-operand dtype (f32 accumulate); jnp.float32 for tight parity


def _leaky(x):
    return jnp.where(x > 0, x, NEG_SLOPE * x)


def _round_up(n, m):
    return ((n + m - 1) // m) * m


def _vmem_budget_bytes():
    """~40% of physical VMEM: v5e/v6e (128 MiB) -> ~51 MiB, v7x (64 MiB per TC) -> ~25 MiB."""
    try:
        cap = pltpu.get_tpu_info().vmem_capacity_bytes
    except Exception:                                    # interpret mode / older runtimes
        cap = 128 * 1024 * 1024
    return int(max(cap, 32 * 1024 * 1024) * 0.4)


def _pick_row_tile(n_rows, bytes_per_row, budget, max_tile=1024):
    """Largest row tile (multiple of 8, <= max_tile) whose double-buffered streams fit budget."""
    t = max_tile
    while t > 8 and 2 * t * bytes_per_row > budget:
        t //= 2
    t = max(8, min(t, _round_up(n_rows, 8)))
    return t, _round_up(n_rows, t)


def _pad_rows(x, n_pad):
    n = x.shape[0]
    if n == n_pad:
        return x
    return jnp.pad(x, ((0, n_pad - n),) + ((0, 0),) * (x.ndim - 1))


# ---------------- Kernel 1: fused node-level linears ----------------
# One wide matmul x @ [W1|Wfc] plus one folded matmul producing the packed [el_src | er] slab.
def node_kernel(x_ref, wall_ref, wcomb_ref, ftsrc_ref, packed_ref):
    f_out = ftsrc_ref.shape[1]
    y = _leaky(jnp.dot(x_ref[...].astype(MXU_DTYPE), wall_ref[...],
                       preferred_element_type=jnp.float32))            # [tn, F + H*F]
    ftsrc_ref[...] = y[:, :f_out]                                      # leaky(x @ W1)
    # wcomb = [[ (I+Wsrc_top)@V2 , 0 ], [ 0 , attn_r block-diag ]]  ->  [el_src | er]
    packed_ref[...] = jnp.dot(y.astype(MXU_DTYPE), wcomb_ref[...],
                              preferred_element_type=jnp.float32)      # [tn, 2H]


# ---------------- Kernel 2: per-edge attention logits (all heads at once) ----------------
# el path is folded to el = ftu@A + edg@C; ftu@A was hoisted into K1 and arrives via
# e_pair = el_src[src] + er[dst].  The three ada matmuls are fused into one [te,3F]@[3F,H] dot.
def edge_kernel(epair_ref, edg_ref, ada_ref, c_ref, wada_ref, out_ref):
    e = epair_ref[...] + jnp.dot(edg_ref[...].astype(MXU_DTYPE), c_ref[...],
                                 preferred_element_type=jnp.float32)   # [te, H]
    expo = jnp.dot(ada_ref[...].astype(MXU_DTYPE), wada_ref[...],
                   preferred_element_type=jnp.float32)                 # [te, H]
    out_ref[...] = _leaky(e * jnp.exp(-expo))


# ---------------- Kernel 3: segment (per-destination) softmax + aggregation ----------------
# Padded-neighbor (ELL) form: Dm slots per destination holding incoming-edge logits (NEG_INF
# sentinel in empty slots) and the gathered source features.  O(N*Dm*(H+F)) work, all H heads in
# one grid step, single "parallel" dst-tile grid axis, output written directly as [td, H, F].
def attn_kernel(lg_ref, ftg_ref, out_ref):
    s = lg_ref[...]                                        # [td, H, Dm] f32 logits
    m = jnp.max(s, axis=-1, keepdims=True)                 # [td, H, 1]
    p = jnp.exp(s - m)                                     # empty slots underflow to exactly 0
    denom = jnp.sum(p, axis=-1, keepdims=True)             # >= 1 wherever an edge exists
    # exact divide: review flagged approx-reciprocal near the 1e-5 cutoff; switch to
    # pl.reciprocal(denom, approx=True) when bit-parity with the reference is not required.
    a = p / denom
    a = jnp.where(a < 1e-5, 0.0, a)                        # th.where(a < 1e-5, 0, a)
    a = jnp.where(m > 0.5 * NEG_INF, a, 0.0)               # zero-in-degree rows -> all-zero
    out_ref[...] = jnp.einsum("nhk,nkf->nhf", a.astype(MXU_DTYPE), ftg_ref[...],
                              preferred_element_type=jnp.float32)      # [td, H, F]
    # TODO(synk): at production F (>=128) store a lane-dense [td, H*F] slab instead of [td, H, F].


# ---------------- Wrapper ----------------
def adagat_forward(params, feat, edg, ada_c, ada_t, ada_d, src, dst, *, d_max):
    """AdaGATConv forward.  `d_max` (static) is the maximum in-degree of the graph."""
    f32 = jnp.float32
    N, Din = feat.shape
    E, De = edg.shape
    H, F = params["attn_r"].shape
    budget = _vmem_budget_bytes()

    # ---- trace-time algebraic weight folding (all-linear paths) ----
    v2 = jnp.einsum("fhg,hg->fh", params["W2"].reshape(F, H, F), params["attn_l"])    # [F, H]
    fold_a = (jnp.eye(F, dtype=f32) + params["Wsrc"][:F]) @ v2                        # [F, H]
    fold_c = params["W0"] @ params["Wsrc"][F:] @ v2                                   # [De, H]
    w_ada = jnp.concatenate(
        [params["coef"][0] * params["Wac"].reshape(F, H, F).mean(axis=-1),
         params["coef"][1] * params["Wat"].reshape(F, H, F).mean(axis=-1),
         params["coef"][2] * params["Wad"].reshape(F, H, F).mean(axis=-1)], axis=0)    # [3F, H]
    w_all = jnp.concatenate([params["W1"], params["Wfc"]], axis=1)                     # [Din, F+H*F]
    w_r = (params["attn_r"][:, :, None] * jnp.eye(H, dtype=f32)[:, None, :]).reshape(H * F, H)
    w_comb = jnp.zeros((F + H * F, 2 * H), f32).at[:F, :H].set(fold_a).at[F:, H:].set(w_r)
    w_all, w_comb, fold_c, w_ada = (w.astype(MXU_DTYPE) for w in (w_all, w_comb, fold_c, w_ada))

    pin = lambda shape: pl.BlockSpec(shape, lambda i, _s=shape: tuple(0 for _ in _s))

    # ---- K1: node kernel, row-tiled "parallel" grid over N ----
    tn, n_pad = _pick_row_tile(N, 4 * (Din + (F + H * F) + F + 2 * H), budget)
    ft_src_p, packed_p = pl.pallas_call(
        node_kernel,
        out_shape=(jax.ShapeDtypeStruct((n_pad, F), f32),
                   jax.ShapeDtypeStruct((n_pad, 2 * H), f32)),
        grid=(n_pad // tn,),
        in_specs=[pl.BlockSpec((tn, Din), lambda i: (i, 0)),
                  pin((Din, F + H * F)), pin((F + H * F, 2 * H))],
        out_specs=(pl.BlockSpec((tn, F), lambda i: (i, 0)),
                   pl.BlockSpec((tn, 2 * H), lambda i: (i, 0))),
        compiler_params=pltpu.CompilerParams(dimension_semantics=("parallel",),
                                             vmem_limit_bytes=budget),
    )(_pad_rows(feat, n_pad), w_all, w_comb)
    ft_src = ft_src_p[:N]                  # [N, F]  leaky(feat @ W1)
    el_src = packed_p[:N, :H]              # [N, H]  ft_src @ (I + Wsrc_top) @ V2
    er = packed_p[:N, H:]                  # [N, H]

    # glue: gather the two narrow [*, H] node terms onto edges (E*H floats, not E*F)
    e_pair = el_src[src] + er[dst]                               # [E, H]
    ada_cat = jnp.concatenate([ada_c, ada_t, ada_d], axis=1)     # [E, 3F]

    # ---- K2: edge kernel, row-tiled "parallel" grid over E ----
    te, e_pad = _pick_row_tile(E, 4 * (H + De + 3 * F + H), budget)
    e_edges = pl.pallas_call(
        edge_kernel,
        out_shape=jax.ShapeDtypeStruct((e_pad, H), f32),
        grid=(e_pad // te,),
        in_specs=[pl.BlockSpec((te, H), lambda i: (i, 0)),
                  pl.BlockSpec((te, De), lambda i: (i, 0)),
                  pl.BlockSpec((te, 3 * F), lambda i: (i, 0)),
                  pin((De, H)), pin((3 * F, H))],
        out_specs=pl.BlockSpec((te, H), lambda i: (i, 0)),
        compiler_params=pltpu.CompilerParams(dimension_semantics=("parallel",),
                                             vmem_limit_bytes=budget),
    )(_pad_rows(e_pair, e_pad), _pad_rows(edg, e_pad), _pad_rows(ada_cat, e_pad),
      fold_c, w_ada)[:E]

    # glue: padded-neighbor (ELL) packing - O(E) scatters, no dense [H, N, N] logit tensor.
    # Duplicate/parallel edges keep their own slot, so multigraph semantics match the reference.
    dm = _round_up(max(d_max, 1), 8)
    td, n_pad3 = _pick_row_tile(
        N, 3 * 4 * H * dm + jnp.dtype(MXU_DTYPE).itemsize * dm * F + 4 * H * F, budget)
    order = jnp.argsort(dst)                                     # group edges by destination
    dst_s, src_s, e_s = dst[order], src[order], e_edges[order]
    counts = jnp.bincount(dst, length=N)
    starts = jnp.concatenate([jnp.zeros((1,), counts.dtype), jnp.cumsum(counts)[:-1]])
    slot = jnp.arange(E, dtype=jnp.int32) - starts[dst_s]        # position within dst segment
    nbr_lg = jnp.full((n_pad3, H, dm), NEG_INF, f32).at[dst_s, :, slot].set(e_s)
    nbr_src = jnp.zeros((n_pad3, dm), jnp.int32).at[dst_s, slot].set(src_s)
    ftg = ft_src.astype(MXU_DTYPE)[nbr_src]                      # [n_pad3, dm, F]

    # ---- K3: per-dst-tile softmax + aggregation (single "parallel" dst axis) ----
    out_nhf = pl.pallas_call(
        attn_kernel,
        out_shape=jax.ShapeDtypeStruct((n_pad3, H, F), f32),
        grid=(n_pad3 // td,),
        in_specs=[pl.BlockSpec((td, H, dm), lambda i: (i, 0, 0)),
                  pl.BlockSpec((td, dm, F), lambda i: (i, 0, 0))],
        out_specs=pl.BlockSpec((td, H, F), lambda i: (i, 0, 0)),
        compiler_params=pltpu.CompilerParams(dimension_semantics=("parallel",),
                                             vmem_limit_bytes=budget),
    )(nbr_lg, ftg)

    rst = out_nhf[:N] + params["bias"].reshape(1, H, F)          # already [N, H, F]: no transpose
    # residual=False, activation=None, feat/attn dropout p=0 -> identities
    return rst


# ---------------- Pure-f32 reference (edge-list / segment ops, mirrors the PyTorch module) ----
def adagat_reference(params, feat, edg, ada_c, ada_t, ada_d, src, dst, N):
    H, F = params["attn_r"].shape
    E = edg.shape[0]
    feat_dst = (feat @ params["Wfc"]).reshape(N, H, F)
    feat_src = _leaky(feat @ params["W1"])
    er = jnp.sum(_leaky(feat_dst) * params["attn_r"][None], axis=-1)              # [N, H]
    ftu = feat_src[src]
    h0 = edg @ params["W0"]
    hsrc = jnp.concatenate([ftu, h0], axis=1) @ params["Wsrc"]
    el = jnp.sum(((ftu + hsrc) @ params["W2"]).reshape(E, H, F)
                 * params["attn_l"][None], axis=-1)                               # [E, H]
    e = el + er[dst]
    cm = jnp.mean((ada_c @ params["Wac"]).reshape(E, H, F), axis=-1)
    tm = jnp.mean((ada_t @ params["Wat"]).reshape(E, H, F), axis=-1)
    dm = jnp.mean((ada_d @ params["Wad"]).reshape(E, H, F), axis=-1)
    a_c, a_t, a_d = params["coef"][0], params["coef"][1], params["coef"][2]
    e = _leaky(e * jnp.exp(-a_c * cm) * jnp.exp(-a_t * tm) * jnp.exp(-a_d * dm))
    emax = jax.ops.segment_max(e, dst, num_segments=N)
    p = jnp.exp(e - emax[dst])
    denom = jax.ops.segment_sum(p, dst, num_segments=N)
    a = p / denom[dst]
    a = jnp.where(a < 1e-5, 0.0, a)
    msg = ftu[:, None, :] * a[:, :, None]                                         # [E, H, F]
    rst = jax.ops.segment_sum(msg, dst, num_segments=N)                           # [N, H, F]
    return rst + params["bias"].reshape(1, H, F)


def make_params(key, in_feats, edg_feats, out_feats, num_heads):
    gain = np.sqrt(2.0)

    def xav(k, fan_in, fan_out, shape):
        std = gain * np.sqrt(2.0 / (fan_in + fan_out))
        return (std * jax.random.normal(k, shape)).astype(jnp.float32)

    ks = jax.random.split(key, 10)
    H, F = num_heads, out_feats
    return {
        "Wfc":   xav(ks[0], in_feats, H * F, (in_feats, H * F)),
        "W0":    xav(ks[1], edg_feats, F, (edg_feats, F)),
        "W1":    xav(ks[2], in_feats, F, (in_feats, F)),
        "W2":    xav(ks[3], F, H * F, (F, H * F)),
        "Wsrc":  xav(ks[4], 2 * F, F, (2 * F, F)),
        "Wac":   xav(ks[5], F, H * F, (F, H * F)),
        "Wat":   xav(ks[6], F, H * F, (F, H * F)),
        "Wad":   xav(ks[7], F, H * F, (F, H * F)),
        "attn_l": xav(ks[8], F, H, (H, F)),
        "attn_r": xav(ks[9], F, H, (H, F)),
        "coef":  jnp.array([0.3, 0.3, 0.3], jnp.float32),       # a_c, a_t, a_d
        "bias":  jnp.zeros((H * F,), jnp.float32),
    }


if __name__ == "__main__":
    N, in_feats, edg_feats, out_feats, num_heads = 16, 8, 6, 8, 4

    # synthetic graph: every node i receives edges from i, (i+1)%N, (i+5)%N  -> E = 3N
    dst_np = np.repeat(np.arange(N), 3)
    src_np = np.stack([np.arange(N),
                       (np.arange(N) + 1) % N,
                       (np.arange(N) + 5) % N], axis=1).reshape(-1)
    src = jnp.asarray(src_np, jnp.int32)
    dst = jnp.asarray(dst_np, jnp.int32)
    E = src.shape[0]
    d_max = int(np.bincount(dst_np, minlength=N).max())          # static max in-degree (= 3)

    key = jax.random.PRNGKey(0)
    kp, kf, ke, kc, kt, kd = jax.random.split(key, 6)
    params = make_params(kp, in_feats, edg_feats, out_feats, num_heads)
    feat = jax.random.normal(kf, (N, in_feats), jnp.float32)
    edg = jax.random.normal(ke, (E, edg_feats), jnp.float32)
    ada_c = jax.random.normal(kc, (E, out_feats), jnp.float32)
    ada_t = jax.random.normal(kt, (E, out_feats), jnp.float32)
    ada_d = jax.random.normal(kd, (E, out_feats), jnp.float32)

    fwd = jax.jit(adagat_forward, static_argnames=("d_max",))
    out = fwd(params, feat, edg, ada_c, ada_t, ada_d, src, dst, d_max=d_max)
    out = jax.block_until_ready(out)
    assert out.shape == (N, num_heads, out_feats)

    ref = adagat_reference(params, feat, edg, ada_c, ada_t, ada_d, src, dst, N)
    # Kernels run matmuls with bf16 operands (f32 accumulate) while the reference is pure f32,
    # so the tolerance is sized for bf16 operand rounding amplified through the edge softmax.
    # With MXU_DTYPE = jnp.float32 this comparison holds at rtol=1e-2 / atol=1e-3.
    if MXU_DTYPE == jnp.float32:
        tol = dict(rtol=1e-2, atol=1e-3)
    else:
        tol = dict(rtol=5e-2, atol=5e-2)
    np.testing.assert_allclose(np.asarray(out), np.asarray(ref), **tol)

    print("KERNEL_OK")
</pallas_src>

<mosaic_0001>
module attributes {stable_mosaic.version = 11 : i64} {
  func.func @node_kernel(%arg0: i32, %arg1: memref<16x8xf32, #tpu.memory_space<vmem>>, %arg2: memref<8x40xbf16, #tpu.memory_space<vmem>>, %arg3: memref<40x8xbf16, #tpu.memory_space<vmem>>, %arg4: memref<16x8xf32, #tpu.memory_space<vmem>>, %arg5: memref<16x8xf32, #tpu.memory_space<vmem>>) attributes {dimension_semantics = [#tpu.dimension_semantics<parallel>], iteration_bounds = array<i64: 1>, scalar_prefetch = 0 : i64, scratch_operands = 0 : i64, tpu.core_type = #tpu.core_type<tc>, window_params = [{transform_indices = @transform_0, window_bounds = array<i64: 16, 8>}, {pipeline_mode = #tpu.pipeline_mode<synchronous>, transform_indices = @transform_1, window_bounds = array<i64: 8, 40>}, {pipeline_mode = #tpu.pipeline_mode<synchronous>, transform_indices = @transform_2, window_bounds = array<i64: 40, 8>}, {transform_indices = @transform_3, window_bounds = array<i64: 16, 8>}, {transform_indices = @transform_4, window_bounds = array<i64: 16, 8>}]} {
    %c0 = arith.constant 0 : index
    %c0_0 = arith.constant 0 : index
    %0 = vector.load %arg1[%c0, %c0_0] : memref<16x8xf32, #tpu.memory_space<vmem>>, vector<16x8xf32>
    %1 = arith.truncf %0 : vector<16x8xf32> to vector<16x8xbf16>
    %c0_1 = arith.constant 0 : index
    %c0_2 = arith.constant 0 : index
    %2 = vector.load %arg2[%c0_1, %c0_2] : memref<8x40xbf16, #tpu.memory_space<vmem>>, vector<8x40xbf16>
    %cst = arith.constant dense<0.000000e+00> : vector<16x40xf32>
    %3 = tpu.matmul %1, %2, %cst {dimension_numbers = #tpu.dot_dimension_numbers<[1], [0], [0], [1], [0, 0, 1, 1], [], []>} : vector<16x8xbf16>, vector<8x40xbf16>, vector<16x40xf32> -> vector<16x40xf32>
    %cst_3 = arith.constant 0.000000e+00 : f32
    %4 = vector.broadcast %cst_3 : f32 to vector<16x40xf32>
    %5 = arith.cmpf ogt, %3, %4 : vector<16x40xf32>
    %cst_4 = arith.constant 2.000000e-01 : f32
    %6 = vector.broadcast %cst_4 : f32 to vector<16x40xf32>
    %7 = arith.mulf %6, %3 : vector<16x40xf32>
    %8 = arith.select %5, %3, %7 : vector<16x40xi1>, vector<16x40xf32>
    %9 = vector.extract_strided_slice %8 {offsets = [0, 0], sizes = [16, 8], strides = [1, 1]} : vector<16x40xf32> to vector<16x8xf32>
    %c0_5 = arith.constant 0 : index
    %c0_6 = arith.constant 0 : index
    %10 = vector.load %arg4[%c0_5, %c0_6] : memref<16x8xf32, #tpu.memory_space<vmem>>, vector<16x8xf32>
    tpu.vector_store %arg4[%c0_5, %c0_6], %9 {strides = array<i32>} : memref<16x8xf32, #tpu.memory_space<vmem>>, vector<16x8xf32>,
    %11 = arith.truncf %8 : vector<16x40xf32> to vector<16x40xbf16>
    %c0_7 = arith.constant 0 : index
    %c0_8 = arith.constant 0 : index
    %12 = vector.load %arg3[%c0_7, %c0_8] : memref<40x8xbf16, #tpu.memory_space<vmem>>, vector<40x8xbf16>
    %cst_9 = arith.constant dense<0.000000e+00> : vector<16x8xf32>
    %13 = tpu.matmul %11, %12, %cst_9 {dimension_numbers = #tpu.dot_dimension_numbers<[1], [0], [0], [1], [0, 0, 1, 1], [], []>} : vector<16x40xbf16>, vector<40x8xbf16>, vector<16x8xf32> -> vector<16x8xf32>
    %c0_10 = arith.constant 0 : index
    %c0_11 = arith.constant 0 : index
    %14 = vector.load %arg5[%c0_10, %c0_11] : memref<16x8xf32, #tpu.memory_space<vmem>>, vector<16x8xf32>
    tpu.vector_store %arg5[%c0_10, %c0_11], %13 {strides = array<i32>} : memref<16x8xf32, #tpu.memory_space<vmem>>, vector<16x8xf32>,
    return
  }
  func.func @transform_0(%arg0: i32) -> (i32, i32) {
    %c0_i32 = arith.constant 0 : i32
    %c0_i32_0 = arith.constant 0 : i32
    return %arg0, %c0_i32 : i32, i32
  }
  func.func @transform_1(%arg0: i32) -> (i32, i32) {
    %c0_i32 = arith.constant 0 : i32
    %c0_i32_0 = arith.constant 0 : i32
    %c0_i32_1 = arith.constant 0 : i32
    return %c0_i32, %c0_i32_0 : i32, i32
  }
  func.func @transform_2(%arg0: i32) -> (i32, i32) {
    %c0_i32 = arith.constant 0 : i32
    %c0_i32_0 = arith.constant 0 : i32
    %c0_i32_1 = arith.constant 0 : i32
    return %c0_i32, %c0_i32_0 : i32, i32
  }
  func.func @transform_3(%arg0: i32) -> (i32, i32) {
    %c0_i32 = arith.constant 0 : i32
    %c0_i32_0 = arith.constant 0 : i32
    return %arg0, %c0_i32 : i32, i32
  }
  func.func @transform_4(%arg0: i32) -> (i32, i32) {
    %c0_i32 = arith.constant 0 : i32
    %c0_i32_0 = arith.constant 0 : i32
    return %arg0, %c0_i32 : i32, i32
  }
}

module attributes {stable_mosaic.version = 11 : i64} {
  func.func @edge_kernel(%arg0: i32, %arg1: memref<48x4xf32, #tpu.memory_space<vmem>>, %arg2: memref<48x6xf32, #tpu.memory_space<vmem>>, %arg3: memref<48x24xf32, #tpu.memory_space<vmem>>, %arg4: memref<6x4xbf16, #tpu.memory_space<vmem>>, %arg5: memref<24x4xbf16, #tpu.memory_space<vmem>>, %arg6: memref<48x4xf32, #tpu.memory_space<vmem>>) attributes {dimension_semantics = [#tpu.dimension_semantics<parallel>], iteration_bounds = array<i64: 1>, scalar_prefetch = 0 : i64, scratch_operands = 0 : i64, tpu.core_type = #tpu.core_type<tc>, window_params = [{transform_indices = @transform_0, window_bounds = array<i64: 48, 4>}, {transform_indices = @transform_1, window_bounds = array<i64: 48, 6>}, {transform_indices = @transform_2, window_bounds = array<i64: 48, 24>}, {pipeline_mode = #tpu.pipeline_mode<synchronous>, transform_indices = @transform_3, window_bounds = array<i64: 6, 4>}, {pipeline_mode = #tpu.pipeline_mode<synchronous>, transform_indices = @transform_4, window_bounds = array<i64: 24, 4>}, {transform_indices = @transform_5, window_bounds = array<i64: 48, 4>}]} {
    %c0 = arith.constant 0 : index
    %c0_0 = arith.constant 0 : index
    %0 = vector.load %arg1[%c0, %c0_0] : memref<48x4xf32, #tpu.memory_space<vmem>>, vector<48x4xf32>
    %c0_1 = arith.constant 0 : index
    %c0_2 = arith.constant 0 : index
    %1 = vector.load %arg2[%c0_1, %c0_2] : memref<48x6xf32, #tpu.memory_space<vmem>>, vector<48x6xf32>
    %2 = arith.truncf %1 : vector<48x6xf32> to vector<48x6xbf16>
    %c0_3 = arith.constant 0 : index
    %c0_4 = arith.constant 0 : index
    %3 = vector.load %arg4[%c0_3, %c0_4] : memref<6x4xbf16, #tpu.memory_space<vmem>>, vector<6x4xbf16>
    %cst = arith.constant dense<0.000000e+00> : vector<48x4xf32>
    %4 = tpu.matmul %2, %3, %cst {dimension_numbers = #tpu.dot_dimension_numbers<[1], [0], [0], [1], [0, 0, 1, 1], [], []>} : vector<48x6xbf16>, vector<6x4xbf16>, vector<48x4xf32> -> vector<48x4xf32>
    %5 = arith.addf %0, %4 : vector<48x4xf32>
    %c0_5 = arith.constant 0 : index
    %c0_6 = arith.constant 0 : index
    %6 = vector.load %arg3[%c0_5, %c0_6] : memref<48x24xf32, #tpu.memory_space<vmem>>, vector<48x24xf32>
    %7 = arith.truncf %6 : vector<48x24xf32> to vector<48x24xbf16>
    %c0_7 = arith.constant 0 : index
    %c0_8 = arith.constant 0 : index
    %8 = vector.load %arg5[%c0_7, %c0_8] : memref<24x4xbf16, #tpu.memory_space<vmem>>, vector<24x4xbf16>
    %cst_9 = arith.constant dense<0.000000e+00> : vector<48x4xf32>
    %9 = tpu.matmul %7, %8, %cst_9 {dimension_numbers = #tpu.dot_dimension_numbers<[1], [0], [0], [1], [0, 0, 1, 1], [], []>} : vector<48x24xbf16>, vector<24x4xbf16>, vector<48x4xf32> -> vector<48x4xf32>
    %cst_10 = arith.constant 0.000000e+00 : f32
    %10 = vector.broadcast %cst_10 : f32 to vector<48x4xf32>
    %11 = arith.subf %10, %9 : vector<48x4xf32>
    %12 = math.exp %11 : vector<48x4xf32>
    %13 = arith.mulf %5, %12 : vector<48x4xf32>
    %cst_11 = arith.constant 0.000000e+00 : f32
    %14 = vector.broadcast %cst_11 : f32 to vector<48x4xf32>
    %15 = arith.cmpf ogt, %13, %14 : vector<48x4xf32>
    %cst_12 = arith.constant 2.000000e-01 : f32
    %16 = vector.broadcast %cst_12 : f32 to vector<48x4xf32>
    %17 = arith.mulf %16, %13 : vector<48x4xf32>
    %18 = arith.select %15, %13, %17 : vector<48x4xi1>, vector<48x4xf32>
    %c0_13 = arith.constant 0 : index
    %c0_14 = arith.constant 0 : index
    %19 = vector.load %arg6[%c0_13, %c0_14] : memref<48x4xf32, #tpu.memory_space<vmem>>, vector<48x4xf32>
    tpu.vector_store %arg6[%c0_13, %c0_14], %18 {strides = array<i32>} : memref<48x4xf32, #tpu.memory_space<vmem>>, vector<48x4xf32>,
    return
  }
  func.func @transform_0(%arg0: i32) -> (i32, i32) {
    %c0_i32 = arith.constant 0 : i32
    %c0_i32_0 = arith.constant 0 : i32
    return %arg0, %c0_i32 : i32, i32
  }
  func.func @transform_1(%arg0: i32) -> (i32, i32) {
    %c0_i32 = arith.constant 0 : i32
    %c0_i32_0 = arith.constant 0 : i32
    return %arg0, %c0_i32 : i32, i32
  }
  func.func @transform_2(%arg0: i32) -> (i32, i32) {
    %c0_i32 = arith.constant 0 : i32
    %c0_i32_0 = arith.constant 0 : i32
    return %arg0, %c0_i32 : i32, i32
  }
  func.func @transform_3(%arg0: i32) -> (i32, i32) {
    %c0_i32 = arith.constant 0 : i32
    %c0_i32_0 = arith.constant 0 : i32
    %c0_i32_1 = arith.constant 0 : i32
    return %c0_i32, %c0_i32_0 : i32, i32
  }
  func.func @transform_4(%arg0: i32) -> (i32, i32) {
    %c0_i32 = arith.constant 0 : i32
    %c0_i32_0 = arith.constant 0 : i32
    %c0_i32_1 = arith.constant 0 : i32
    return %c0_i32, %c0_i32_0 : i32, i32
  }
  func.func @transform_5(%arg0: i32) -> (i32, i32) {
    %c0_i32 = arith.constant 0 : i32
    %c0_i32_0 = arith.constant 0 : i32
    return %arg0, %c0_i32 : i32, i32
  }
}

module attributes {stable_mosaic.version = 11 : i64} {
  func.func @attn_kernel(%arg0: i32, %arg1: memref<16x4x8xf32, #tpu.memory_space<vmem>>, %arg2: memref<16x8x8xbf16, #tpu.memory_space<vmem>>, %arg3: memref<16x4x8xf32, #tpu.memory_space<vmem>>) attributes {dimension_semantics = [#tpu.dimension_semantics<parallel>], iteration_bounds = array<i64: 1>, scalar_prefetch = 0 : i64, scratch_operands = 0 : i64, tpu.core_type = #tpu.core_type<tc>, window_params = [{transform_indices = @transform_0, window_bounds = array<i64: 16, 4, 8>}, {transform_indices = @transform_1, window_bounds = array<i64: 16, 8, 8>}, {transform_indices = @transform_2, window_bounds = array<i64: 16, 4, 8>}]} {
    %c0 = arith.constant 0 : index
    %c0_0 = arith.constant 0 : index
    %c0_1 = arith.constant 0 : index
    %0 = vector.load %arg1[%c0, %c0_0, %c0_1] : memref<16x4x8xf32, #tpu.memory_space<vmem>>, vector<16x4x8xf32>
    %cst = arith.constant dense<0xFF800000> : vector<16x4xf32>
    %1 = vector.multi_reduction <maximumf>, %0, %cst [2] : vector<16x4x8xf32> to vector<16x4xf32>
    %2 = vector.shape_cast %1 : vector<16x4xf32> to vector<16x4x1xf32>
    %3 = vector.broadcast %2 : vector<16x4x1xf32> to vector<16x4x8xf32>
    %4 = arith.subf %0, %3 : vector<16x4x8xf32>
    %5 = math.exp %4 : vector<16x4x8xf32>
    %cst_2 = arith.constant dense<0.000000e+00> : vector<16x4xf32>
    %6 = vector.multi_reduction <add>, %5, %cst_2 [2] : vector<16x4x8xf32> to vector<16x4xf32>
    %7 = vector.shape_cast %6 : vector<16x4xf32> to vector<16x4x1xf32>
    %8 = vector.broadcast %7 : vector<16x4x1xf32> to vector<16x4x8xf32>
    %9 = arith.divf %5, %8 : vector<16x4x8xf32>
    %cst_3 = arith.constant 9.99999974E-6 : f32
    %10 = vector.broadcast %cst_3 : f32 to vector<16x4x8xf32>
    %11 = arith.cmpf olt, %9, %10 : vector<16x4x8xf32>
    %cst_4 = arith.constant 0.000000e+00 : f32
    %12 = vector.broadcast %cst_4 : f32 to vector<16x4x8xf32>
    %13 = arith.select %11, %12, %9 : vector<16x4x8xi1>, vector<16x4x8xf32>
    %cst_5 = arith.constant -5.000000e+29 : f32
    %14 = vector.broadcast %cst_5 : f32 to vector<16x4x1xf32>
    %15 = arith.cmpf ogt, %2, %14 : vector<16x4x1xf32>
    %cst_6 = arith.constant 0.000000e+00 : f32
    %16 = vector.shape_cast %15 : vector<16x4x1xi1> to vector<16x4x1xi1>
    %17 = vector.broadcast %16 : vector<16x4x1xi1> to vector<16x4x8xi1>
    %18 = vector.broadcast %cst_6 : f32 to vector<16x4x8xf32>
    %19 = arith.select %17, %13, %18 : vector<16x4x8xi1>, vector<16x4x8xf32>
    %20 = arith.truncf %19 : vector<16x4x8xf32> to vector<16x4x8xbf16>
    %c0_7 = arith.constant 0 : index
    %c0_8 = arith.constant 0 : index
    %c0_9 = arith.constant 0 : index
    %21 = vector.load %arg2[%c0_7, %c0_8, %c0_9] : memref<16x8x8xbf16, #tpu.memory_space<vmem>>, vector<16x8x8xbf16>
    "tpu.trace_start"() <{level = 10 : i32, message = "nhk,nkf->nhf"}> : () -> ()
    %cst_10 = arith.constant dense<0.000000e+00> : vector<16x4x8xf32>
    %22 = tpu.matmul %20, %21, %cst_10 {dimension_numbers = #tpu.dot_dimension_numbers<[2], [1], [1], [2], [0, 0, 0, 1, 1, 2], [0], [0]>} : vector<16x4x8xbf16>, vector<16x8x8xbf16>, vector<16x4x8xf32> -> vector<16x4x8xf32>
    "tpu.trace_stop"() : () -> ()
    %c0_11 = arith.constant 0 : index
    %c0_12 = arith.constant 0 : index
    %c0_13 = arith.constant 0 : index
    %23 = vector.load %arg3[%c0_11, %c0_12, %c0_13] : memref<16x4x8xf32, #tpu.memory_space<vmem>>, vector<16x4x8xf32>
    tpu.vector_store %arg3[%c0_11, %c0_12, %c0_13], %22 {strides = array<i32>} : memref<16x4x8xf32, #tpu.memory_space<vmem>>, vector<16x4x8xf32>,
    return
  }
  func.func @transform_0(%arg0: i32) -> (i32, i32, i32) {
    %c0_i32 = arith.constant 0 : i32
    %c0_i32_0 = arith.constant 0 : i32
    %c0_i32_1 = arith.constant 0 : i32
    return %arg0, %c0_i32, %c0_i32_0 : i32, i32, i32
  }
  func.func @transform_1(%arg0: i32) -> (i32, i32, i32) {
    %c0_i32 = arith.constant 0 : i32
    %c0_i32_0 = arith.constant 0 : i32
    %c0_i32_1 = arith.constant 0 : i32
    return %arg0, %c0_i32, %c0_i32_0 : i32, i32, i32
  }
  func.func @transform_2(%arg0: i32) -> (i32, i32, i32) {
    %c0_i32 = arith.constant 0 : i32
    %c0_i32_0 = arith.constant 0 : i32
    %c0_i32_1 = arith.constant 0 : i32
    return %arg0, %c0_i32, %c0_i32_0 : i32, i32, i32
  }
}

</mosaic_0001>

<bundles_post_ra>
// kernel: adagat_forward.3
= control target key start
LH: loop header
LB: loop body
LE: loop exit
PB: predicated region body
PF: predicated region fallthrough
CT: control target
= control target key end

     0   :  { %vm25_vm0 = vcmask 1043456   ;;  %vm21_vm1 = vcmask 64512   ;;  %vm72_vm4 = vcmask 326656   ;;  %s175_s1 = inlined_call_operand.vmem [shape: bf16[8,40], index: 1, kind: input, shape index: {}]   ;;  %s176_s0 = inlined_call_operand.vmem [shape: f32[16,8], index: 0, kind: input, shape index: {}]   ;;  %s177_s2 = inlined_call_operand.vmem [shape: bf16[40,8], index: 2, kind: input, shape index: {}]   ;;  %s178_s3 = inlined_call_operand.vmem [shape: f32[16,8], index: 3, kind: output, shape index: {0}]   ;;  %s179_s4 = inlined_call_operand.vmem [shape: f32[16,8], index: 4, kind: output, shape index: {1}]  }
   0x1   :  { %v20_v0 = vld [vmem:[%s175_s1] sm:$0xf]  ;;  %v18_v2 = vld [vmem:[%s176_s0 + $0x8] sm:$0xff]  ;;  %v56_v5 = vld [vmem:[%s177_s2 + $0x10] sm:$0xf] }
   0x2   :  { %v17_v1 = vld [vmem:[%s176_s0] sm:$0xff]  ;;  %v27_v3 = vsel %vm25_vm0, %v20_v0, 0  ;;  %v66_v6 = vunpack.c.l.b16 %v56_v5  ;;  %v114_v9 = vld [vmem:[%s177_s2 + $0x8] sm:$0xff] }
   0x3   :  { %v19_v4 = vpack.c.bf16 %v18_v2, %v17_v1  ;;  %36 = vmatpush.bf16.msra.mxu0 %v27_v3  ;;  %v113_v10 = vld [vmem:[%s177_s2] sm:$0xff] }
   0x4   :  { %v69_v7 = vpack.c.b16 %v66_v6, %v66_v6 }
   0x6   :  { %103 = vmatmul.msk.bf16.vlgmr.msra.gmra.mxu0 %vm21_vm1, %v19_v4  ;;  %v77_v8 = vsel %vm25_vm0, %v69_v7, 0 }
   0x7   :  { %84 = vmatpush.bf16.msra.mxu1 %v77_v8 }
   0xb   :  { %85 = vmatpush.bf16.msra.mxu1 %v114_v9 }
   0xf   :  { %86 = vmatpush.bf16.msra.mxu1 %v113_v10 }
  0x83   :  { %v38_v11 = vpop.f32.mrf.mxu0 }
  0x84   :  { %vm43_vm2 = vcmp.gt.f32.partialorder %v38_v11, 0.0  ;;  %v45_v12 = vmul.f32 0.2, %v38_v11 }
  0x86   :  { %v47_v13 = vsel %vm43_vm2, %v38_v11, %v45_v12 }
  0x87   :  { %49 = vst.msk [vmem:[%s178_s3] sm:$0xff] %vm21_vm1, %v47_v13 }
  0x8b   :  { %v40_v14 = vpop.f32.mrf.mxu0 }
  0x8c   :  { %vm44_vm3 = vcmp.gt.f32.partialorder %v40_v14, 0.0  ;;  %v46_v15 = vmul.f32 0.2, %v40_v14 }
  0x8e   :  { %v48_v16 = vsel %vm44_vm3, %v40_v14, %v46_v15 }
  0x8f   :  { %50 = vst.msk [vmem:[%s178_s3 + $0x8] sm:$0xff] %vm21_vm1, %v48_v16  ;;  %v51_v17 = vpack.c.bf16 %v48_v16, %v47_v13 }
  0x91   :  { %112 = vmatmul.msk.bf16.vlgmr.msra.gmra.mxu1 %vm72_vm4, %v51_v17 }
 0x10e   :  { %v88_v18 = vpop.f32.mrf.mxu1 }
 0x10f   :  { %93 = vst.msk [vmem:[%s179_s4] sm:$0xff] %vm21_vm1, %v88_v18 }
 0x116   :  { %v90_v19 = vpop.f32.mrf.mxu1 }
 0x117   :  { %94 = vst.msk [vmem:[%s179_s4 + $0x8] sm:$0xff] %vm21_vm1, %v90_v19 }

// kernel: adagat_forward.4
= control target key start
LH: loop header
LB: loop body
LE: loop exit
PB: predicated region body
PF: predicated region fallthrough
CT: control target
= control target key end

     0   :  { %vm47_vm0 = vcmask 1042432   ;;  %vm37_vm1 = vcmask 48128   ;;  %vm112_vm2 = vcmask 1043456   ;;  %vm102_vm3 = vcmask 195584   ;;  %s344_s3 = inlined_call_operand.vmem [shape: bf16[6,4], index: 3, kind: input, shape index: {}]   ;;  %s345_s1 = inlined_call_operand.vmem [shape: f32[48,6], index: 1, kind: input, shape index: {}]   ;;  %s346_s4 = inlined_call_operand.vmem [shape: bf16[24,4], index: 4, kind: input, shape index: {}]   ;;  %s347_s2 = inlined_call_operand.vmem [shape: f32[48,24], index: 2, kind: input, shape index: {}]   ;;  %s348_s0 = inlined_call_operand.vmem [shape: f32[48,4], index: 0, kind: input, shape index: {}]   ;;  %s349_s5 = inlined_call_operand.vmem [shape: f32[48,4], index: 5, kind: output, shape index: {}]  }
   0x1   :  { %v36_v0 = vld [vmem:[%s344_s3] sm:$0x7]  ;;  %v28_v2 = vld [vmem:[%s345_s1 + $0x8] sm:$0xff]  ;;  %v29_v5 = vld [vmem:[%s345_s1 + $0x10] sm:$0xff]  ;;  %vm182_vm5 = vcmask 31744  }
   0x2   :  { %v27_v1 = vld [vmem:[%s345_s1] sm:$0xff]  ;;  %v49_v3 = vsel %vm47_vm0, %v36_v0, 0  ;;  %v30_v6 = vld [vmem:[%s345_s1 + $0x18] sm:$0xff]  ;;  %v92_v7 = vld [vmem:[%s346_s4 + $0x8] sm:$0xf] }
   0x3   :  { %v33_v4 = vpack.c.bf16 %v28_v2, %v27_v1  ;;  %58 = vmatpush.bf16.msra.mxu0 %v49_v3  ;;  %204 = vmatpush.bf16.msra.mxu3 %v49_v3  ;;  %v34_v8 = vpack.c.bf16 %v30_v6, %v29_v5  ;;  %v98_v9 = vunpack.c.l.b16 %v92_v7  ;;  %v203_v12 = vld [vmem:[%s346_s4] sm:$0xff]  ;;  %v83_v13 = vld [vmem:[%s347_s2 + $0x10] sm:$0xff]  ;;  %v84_v14 = vld [vmem:[%s347_s2 + $0x18] sm:$0xff] }
   0x4   :  { %v85_v15 = vld [vmem:[%s347_s2 + $0x20] sm:$0xff]  ;;  %v86_v16 = vld [vmem:[%s347_s2 + $0x28] sm:$0xff]  ;;  %v88_v17 = vpack.c.bf16 %v84_v14, %v83_v13  ;;  %v23_v32 = vld [vmem:[%s348_s0 + $0x10] sm:$0xff] }
   0x5   :  { %v100_v10 = vpack.c.b16 %v98_v9, %v98_v9  ;;  %v89_v18 = vpack.c.bf16 %v86_v16, %v85_v15  ;;  %v31_v19 = vld [vmem:[%s345_s1 + $0x20] sm:$0xff]  ;;  %v32_v20 = vld [vmem:[%s345_s1 + $0x28] sm:$0xff]  ;;  %v24_v53 = vld [vmem:[%s348_s0 + $0x18] sm:$0xff] }
   0x6   :  { %193 = vmatmul.msk.bf16.vlgmr.msra.gmra.mxu0 %vm37_vm1, %v33_v4  ;;  %194 = vmatmul.msk.bf16.vlgmr.msra.gmra.mxu3 %vm37_vm1, %v34_v8  ;;  %v81_v21 = vld [vmem:[%s347_s2] sm:$0xff]  ;;  %v82_v22 = vld [vmem:[%s347_s2 + $0x8] sm:$0xff]  ;;  %v35_v23 = vpack.c.bf16 %v32_v20, %v31_v19 }
   0x7   :  { %v114_v11 = vsel %vm112_vm2, %v100_v10, 0  ;;  %v87_v24 = vpack.c.bf16 %v82_v22, %v81_v21  ;;  %v25_v45 = vld [vmem:[%s348_s0 + $0x20] sm:$0xff]  ;;  %v26_v1 = vld [vmem:[%s348_s0 + $0x28] sm:$0xff] }
   0x8   :  { %122 = vmatpush.bf16.msrb.mxu0 %v114_v11  ;;  %205 = vmatpush.bf16.msra.mxu1 %v114_v11  ;;  %v21_v48 = vld [vmem:[%s348_s0] sm:$0xff]  ;;  %v22_v6 = vld [vmem:[%s348_s0 + $0x8] sm:$0xff] }
   0x9   :  { %206 = vmatpush.bf16.msra.mxu2 %v114_v11 }
   0xc   :  { %207 = vmatpush.bf16.msra.mxu1 %v203_v12  ;;  %123 = vmatpush.bf16.msrb.mxu0 %v203_v12 }
   0xd   :  { %208 = vmatpush.bf16.msra.mxu2 %v203_v12 }
   0xf   :  { %201 = vmatmul.msk.bf16.vlgmr.msra.gmra.mxu1 %vm102_vm3, %v88_v17 }
  0x10   :  { %202 = vmatmul.msk.bf16.vlgmr.msra.gmra.mxu2 %vm102_vm3, %v89_v18 }
  0x16   :  { %195 = vmatmul.msk.bf16.gmra.mxu3 %vm37_vm1, %v35_v23  ;;  %200 = vmatmul.msk.bf16.vlgmr.msrb.gmra.mxu0 %vm102_vm3, %v87_v24 }
  0x83   :  { %v60_v25 = vpop.f32.mrf.mxu0 }
  0x84   :  { %v75_v57 = vadd.f32 %v60_v25, %v21_v48 }
  0x89   :  { %v65_v26 = vpop.f32.mrf.mxu3 }
  0x8a   :  { %v77_v39 = vadd.f32 %v65_v26, %v23_v32 }
  0x8b   :  { %v299_v27 = vpop.f32.mrf.mxu0 }
  0x8c   :  { %v130_v28 = vpop.f32.mrf.mxu1  ;;  %v76_v13 = vadd.f32 %v299_v27, %v22_v6 }
  0x8d   :  { %v142_v29 = vsub.f32 0.0, %v130_v28 }
  0x8f   :  { %v150_v30 = vmul.f32 1.442695, %v142_v29 }
  0x91   :  { %209 = vpow2.f32 %v150_v30  ;;  %v67_v31 = vpop.f32.mrf.mxu3 }
  0x92   :  { %v78_v61 = vadd.f32 %v67_v31, %v24_v53 }
  0x93   :  { %v135_v33 = vpop.f32.mrf.mxu2  ;;  %v125_v34 = vpop.f32.mrf.mxu0 }
  0x94   :  { %v144_v35 = vsub.f32 0.0, %v135_v33  ;;  %v140_v36 = vsub.f32 0.0, %v125_v34  ;;  %v132_v37 = vpop.f32.mrf.mxu1 }
  0x95   :  { %v143_v38 = vsub.f32 0.0, %v132_v37 }
  0x96   :  { %v154_v40 = vmul.f32 1.442695, %v144_v35  ;;  %v146_v41 = vmul.f32 1.442695, %v140_v36 }
  0x97   :  { %v210_v42 = vpop.eup %209  ;;  %v152_v43 = vmul.f32 1.442695, %v143_v38 }
  0x98   :  { %v160_v44 = vmul.f32 %v210_v42, %v77_v39  ;;  %211 = vpow2.f32 %v154_v40 }
  0x99   :  { %213 = vpow2.f32 %v146_v41  ;;  %v70_v46 = vpop.f32.mrf.mxu3 }
  0x9a   :  { %vm166_vm4 = vcmp.gt.f32.partialorder %v160_v44, 0.0  ;;  %v172_v47 = vmul.f32 0.2, %v160_v44  ;;  %215 = vpow2.f32 %v152_v43  ;;  %v79_v49 = vadd.f32 %v70_v46, %v25_v45 }
  0x9b   :  { %v137_v50 = vpop.f32.mrf.mxu2  ;;  %v127_v51 = vpop.f32.mrf.mxu0 }
  0x9c   :  { %v178_v52 = vsel %vm166_vm4, %v160_v44, %v172_v47  ;;  %v145_v54 = vsub.f32 0.0, %v137_v50  ;;  %v141_v55 = vsub.f32 0.0, %v127_v51 }
  0x9d   :  { %185 = vst.msk [vmem:[%s349_s5 + $0x10] sm:$0xff] %vm182_vm5, %v178_v52 }
  0x9e   :  { %v212_v56 = vpop.eup %211  ;;  %v156_v58 = vmul.f32 1.442695, %v145_v54  ;;  %v148_v59 = vmul.f32 1.442695, %v141_v55 }
  0x9f   :  { %v214_v60 = vpop.eup %213  ;;  %v162_v62 = vmul.f32 %v212_v56, %v79_v49 }
  0xa0   :  { %v216_v63 = vpop.eup %215  ;;  %v158_v0 = vmul.f32 %v214_v60, %v75_v57  ;;  %217 = vpow2.f32 %v156_v58 }
  0xa1   :  { %v161_v2 = vmul.f32 %v216_v63, %v78_v61  ;;  %vm168_vm6 = vcmp.gt.f32.partialorder %v162_v62, 0.0  ;;  %v174_v3 = vmul.f32 0.2, %v162_v62  ;;  %219 = vpow2.f32 %v148_v59  ;;  %v72_v4 = vpop.f32.mrf.mxu3 }
  0xa2   :  { %vm164_vm7 = vcmp.gt.f32.partialorder %v158_v0, 0.0  ;;  %v170_v5 = vmul.f32 0.2, %v158_v0  ;;  %v80_v9 = vadd.f32 %v72_v4, %v26_v1 }
  0xa3   :  { %vm167_vm8 = vcmp.gt.f32.partialorder %v161_v2, 0.0  ;;  %v173_v7 = vmul.f32 0.2, %v161_v2  ;;  %v180_v8 = vsel %vm168_vm6, %v162_v62, %v174_v3 }
  0xa4   :  { %v176_v10 = vsel %vm164_vm7, %v158_v0, %v170_v5  ;;  %187 = vst.msk [vmem:[%s349_s5 + $0x20] sm:$0xff] %vm182_vm5, %v180_v8 }
  0xa5   :  { %183 = vst.msk [vmem:[%s349_s5] sm:$0xff] %vm182_vm5, %v176_v10  ;;  %v179_v11 = vsel %vm167_vm8, %v161_v2, %v173_v7 }
  0xa6   :  { %v218_v12 = vpop.eup %217  ;;  %186 = vst.msk [vmem:[%s349_s5 + $0x18] sm:$0xff] %vm182_vm5, %v179_v11 }
  0xa7   :  { %v220_v14 = vpop.eup %219  ;;  %v163_v15 = vmul.f32 %v218_v12, %v80_v9 }
  0xa8   :  { %v159_v16 = vmul.f32 %v220_v14, %v76_v13 }
  0xa9   :  { %vm169_vm9 = vcmp.gt.f32.partialorder %v163_v15, 0.0  ;;  %v175_v17 = vmul.f32 0.2, %v163_v15 }
  0xaa   :  { %vm165_vm10 = vcmp.gt.f32.partialorder %v159_v16, 0.0  ;;  %v171_v18 = vmul.f32 0.2, %v159_v16 }
  0xab   :  { %v181_v19 = vsel %vm169_vm9, %v163_v15, %v175_v17 }
  0xac   :  { %v177_v20 = vsel %vm165_vm10, %v159_v16, %v171_v18  ;;  %188 = vst.msk [vmem:[%s349_s5 + $0x28] sm:$0xff] %vm182_vm5, %v181_v19 }
  0xad   :  { %184 = vst.msk [vmem:[%s349_s5 + $0x8] sm:$0xff] %vm182_vm5, %v177_v20 }

// kernel: adagat_forward.5
= control target key start
LH: loop header
LB: loop body
LE: loop exit
PB: predicated region body
PF: predicated region fallthrough
CT: control target
= control target key end

     0   :  { %vm1830_vm0 = vcmask 60416   ;;  %vm545_vm1 = vcmask 1043456   ;;  %vm1836_vm8 = vcmask 64512   ;;  %s1821_s0 = inlined_call_operand.vmem [shape: f32[16,4,8], index: 0, kind: input, shape index: {}]   ;;  %s1822_s1 = inlined_call_operand.vmem [shape: bf16[16,8,8], index: 1, kind: input, shape index: {}]   ;;  %s1823_s2 = inlined_call_operand.vmem [shape: f32[16,4,8], index: 2, kind: output, shape index: {}]  }
   0x1   :  { %v14_v0 = vld [vmem:[%s1821_s0 + $0x8] sm:$0xf]  ;;  %v12_v1 = vld [vmem:[%s1821_s0] sm:$0xf]  ;;  %v18_v4 = vld [vmem:[%s1821_s0 + $0x18] sm:$0xf] }
   0x2   :  { %v35_v2 = vsel %vm1830_vm0, %v14_v0, -inf  ;;  %v29_v3 = vsel %vm1830_vm0, %v12_v1, -inf  ;;  %v47_v5 = vsel %vm1830_vm0, %v18_v4, -inf  ;;  %v15_v6 = vld [vmem:[%s1821_s0 + $0xc] sm:$0xf] }
   0x3   :  { %36 = vmax.xlane.f32.xlu0 %v35_v2  ;;  %30 = vmax.xlane.f32.xlu1 %v29_v3  ;;  %v13_v7 = vld [vmem:[%s1821_s0 + $0x4] sm:$0xf]  ;;  %v983_v8 = vld [vmem:[%s1821_s0 + $0x1c] sm:$0xf]  ;;  %v38_v9 = vsel %vm1830_vm0, %v15_v6, -inf }
   0x4   :  { %48 = vmax.xlane.f32.xlu2 %v47_v5  ;;  %v32_v10 = vsel %vm1830_vm0, %v13_v7, -inf  ;;  %v50_v11 = vsel %vm1830_vm0, %v983_v8, -inf  ;;  %v16_v12 = vld [vmem:[%s1821_s0 + $0x10] sm:$0xf]  ;;  %v995_v13 = vld [vmem:[%s1821_s0 + $0x14] sm:$0xf] }
   0x5   :  { %v1000_v14 = vld [vmem:[%s1821_s0 + $0x28] sm:$0xf]  ;;  %v41_v15 = vsel %vm1830_vm0, %v16_v12, -inf  ;;  %v44_v16 = vsel %vm1830_vm0, %v995_v13, -inf  ;;  %v1010_v18 = vld [vmem:[%s1821_s0 + $0x2c] sm:$0xf] }
   0x6   :  { %v59_v17 = vsel %vm1830_vm0, %v1000_v14, -inf  ;;  %v1015_v19 = vld [vmem:[%s1821_s0 + $0x20] sm:$0xf]  ;;  %v1020_v20 = vld [vmem:[%s1821_s0 + $0x24] sm:$0xf]  ;;  %v62_v21 = vsel %vm1830_vm0, %v1010_v18, -inf }
   0x7   :  { %v53_v22 = vsel %vm1830_vm0, %v1015_v19, -inf  ;;  %v56_v23 = vsel %vm1830_vm0, %v1020_v20, -inf  ;;  %v1031_v24 = vld [vmem:[%s1821_s0 + $0x38] sm:$0xf]  ;;  %v1036_v25 = vld [vmem:[%s1821_s0 + $0x3c] sm:$0xf] }
   0x8   :  { %v71_v26 = vsel %vm1830_vm0, %v1031_v24, -inf  ;;  %v74_v27 = vsel %vm1830_vm0, %v1036_v25, -inf  ;;  %v1045_v28 = vld [vmem:[%s1821_s0 + $0x30] sm:$0xf]  ;;  %v1073_v48 = vld [vmem:[%s1821_s0 + $0x34] sm:$0xf] }
   0x9   :  { %v65_v29 = vsel %vm1830_vm0, %v1045_v28, -inf  ;;  %v68_v54 = vsel %vm1830_vm0, %v1073_v48, -inf }
   0xb   :  { %39 = vmax.xlane.f32.xlu0 %v38_v9  ;;  %33 = vmax.xlane.f32.xlu1 %v32_v10 }
   0xc   :  { %51 = vmax.xlane.f32.xlu2 %v50_v11 }
  0x13   :  { %42 = vmax.xlane.f32.xlu0 %v41_v15  ;;  %45 = vmax.xlane.f32.xlu1 %v44_v16 }
  0x14   :  { %60 = vmax.xlane.f32.xlu2 %v59_v17 }
  0x1b   :  { %63 = vmax.xlane.f32.xlu0 %v62_v21  ;;  %54 = vmax.xlane.f32.xlu1 %v53_v22 }
  0x1c   :  { %57 = vmax.xlane.f32.xlu2 %v56_v23 }
  0x23   :  { %72 = vmax.xlane.f32.xlu0 %v71_v26  ;;  %75 = vmax.xlane.f32.xlu1 %v74_v27 }
  0x2b   :  { %66 = vmax.xlane.f32.xlu1 %v65_v29 }
  0x76   :  { %v1049_v30 = vpop.xlane.xlu0 %36  ;;  %v1051_v31 = vpop.xlane.xlu1 %30 }
  0x77   :  { %v79_v32 = vsub.f32 %v14_v0, %v1049_v30  ;;  %v1054_v33 = vpop.xlane.xlu2 %48  ;;  %v77_v35 = vsub.f32 %v12_v1, %v1051_v31  ;;  %vm447_vm6 = vcmp.gt.f32.partialorder %v1049_v30, -5e+29 }
  0x78   :  { %v83_v40 = vsub.f32 %v18_v4, %v1054_v33 }
  0x79   :  { %v97_v34 = vmul.f32 1.442695, %v79_v32  ;;  %v93_v45 = vmul.f32 1.442695, %v77_v35 }
  0x7a   :  { %v105_v47 = vmul.f32 1.442695, %v83_v40 }
  0x7b   :  { %883 = vpow2.f32 %v97_v34 }
  0x7e   :  { %v1057_v36 = vpop.xlane.xlu0 %39  ;;  %v1059_v37 = vpop.xlane.xlu1 %33 }
  0x7f   :  { %v80_v38 = vsub.f32 %v15_v6, %v1057_v36  ;;  %v78_v39 = vsub.f32 %v13_v7, %v1059_v37  ;;  %v1064_v41 = vpop.xlane.xlu2 %51 }
  0x80   :  { %v84_v50 = vsub.f32 %v983_v8, %v1064_v41 }
  0x81   :  { %v1066_v42 = vpop.eup %883  ;;  %v99_v43 = vmul.f32 1.442695, %v80_v38  ;;  %v95_v44 = vmul.f32 1.442695, %v78_v39 }
  0x82   :  { %v131_v46 = vsel %vm1830_vm0, %v1066_v42, 0.0  ;;  %v107_v60 = vmul.f32 1.442695, %v84_v50 }
  0x83   :  { %885 = vpow2.f32 %v99_v43  ;;  %132 = vadd.xlane.f32.xlu2 %v131_v46 }
  0x84   :  { %887 = vpow2.f32 %v95_v44 }
  0x85   :  { %889 = vpow2.f32 %v93_v45 }
  0x86   :  { %v1075_v49 = vpop.xlane.xlu0 %42  ;;  %v1079_v51 = vpop.xlane.xlu1 %45  ;;  %891 = vpow2.f32 %v105_v47 }
  0x87   :  { %v81_v52 = vsub.f32 %v16_v12, %v1075_v49  ;;  %v82_v53 = vsub.f32 %v995_v13, %v1079_v51  ;;  %v1088_v57 = vpop.xlane.xlu2 %60 }
  0x88   :  { %v87_v2 = vsub.f32 %v1000_v14, %v1088_v57 }
  0x89   :  { %v1086_v55 = vpop.eup %885  ;;  %v101_v56 = vmul.f32 1.442695, %v81_v52  ;;  %v103_v62 = vmul.f32 1.442695, %v82_v53  ;;  %v527_v53 = vld [vmem:[%s1822_s1 + $0x8] sm:$0xf] }
  0x8a   :  { %v1090_v58 = vpop.eup %887  ;;  %v134_v59 = vsel %vm1830_vm0, %v1086_v55, 0.0  ;;  %v113_v11 = vmul.f32 1.442695, %v87_v2 }
  0x8b   :  { %893 = vpow2.f32 %v101_v56  ;;  %69 = vmax.xlane.f32.xlu2 %v68_v54  ;;  %135 = vadd.xlane.f32.xlu0 %v134_v59  ;;  %v128_v61 = vsel %vm1830_vm0, %v1090_v58, 0.0  ;;  %v1096_v63 = vpop.eup %889  ;;  %v585_v54 = vsel %vm545_vm1, %v527_v53, 0 }
  0x8c   :  { %129 = vadd.xlane.f32.xlu1 %v128_v61  ;;  %v1098_v0 = vpop.eup %891  ;;  %895 = vpow2.f32 %v107_v60  ;;  %v125_v7 = vsel %vm1830_vm0, %v1096_v63, 0.0  ;;  %594 = vmatpush.bf16.msra.mxu2 %v585_v54 }
  0x8d   :  { %897 = vpow2.f32 %v103_v62  ;;  %v143_v6 = vsel %vm1830_vm0, %v1098_v0, 0.0 }
  0x8e   :  { %v1100_v1 = vpop.xlane.xlu0 %63  ;;  %v1104_v3 = vpop.xlane.xlu1 %54 }
  0x8f   :  { %1839 = vst [vmem:[#allocation2_spill] sm:$0xff] %v1100_v1  ;;  %v88_v4 = vsub.f32 %v1010_v18, %v1100_v1  ;;  %v85_v5 = vsub.f32 %v1015_v19, %v1104_v3  ;;  %v1118_v13 = vpop.xlane.xlu2 %57 }
  0x90   :  { %1840 = vst [vmem:[#allocation3_spill] sm:$0xff] %v1104_v3  ;;  %v86_v17 = vsub.f32 %v1020_v20, %v1118_v13 }
  0x91   :  { %v1114_v8 = vpop.eup %893  ;;  %v115_v9 = vmul.f32 1.442695, %v88_v4  ;;  %v109_v12 = vmul.f32 1.442695, %v85_v5  ;;  %1841 = vst [vmem:[#allocation4_spill] sm:$0xff] %v1118_v13 }
  0x92   :  { %v137_v10 = vsel %vm1830_vm0, %v1114_v8, 0.0  ;;  %v1120_v14 = vpop.eup %895  ;;  %v111_v29 = vmul.f32 1.442695, %v86_v17 }
  0x93   :  { %899 = vpow2.f32 %v115_v9  ;;  %144 = vadd.xlane.f32.xlu2 %v143_v6  ;;  %126 = vadd.xlane.f32.xlu0 %v125_v7  ;;  %v1122_v15 = vpop.eup %897  ;;  %v146_v22 = vsel %vm1830_vm0, %v1120_v14, 0.0  ;;  %v526_v6 = vld [vmem:[%s1822_s1 + $0x4] sm:$0xf]  ;;  %v528_v7 = vld [vmem:[%s1822_s1 + $0xc] sm:$0xf] }
  0x94   :  { %138 = vadd.xlane.f32.xlu1 %v137_v10  ;;  %901 = vpow2.f32 %v113_v11  ;;  %v140_v23 = vsel %vm1830_vm0, %v1122_v15, 0.0  ;;  %v566_v9 = vsel %vm545_vm1, %v526_v6, 0  ;;  %v604_v10 = vsel %vm545_vm1, %v528_v7, 0 }
  0x95   :  { %903 = vpow2.f32 %v109_v12  ;;  %575 = vmatpush.bf16.msra.mxu1 %v566_v9  ;;  %613 = vmatpush.bf16.msra.mxu3 %v604_v10 }
  0x96   :  { %v1124_v16 = vpop.xlane.xlu0 %72  ;;  %v1128_v18 = vpop.xlane.xlu1 %75 }
  0x97   :  { %1842 = vst [vmem:[#allocation5_spill] sm:$0xff] %v1124_v16  ;;  %v91_v19 = vsub.f32 %v1031_v24, %v1124_v16  ;;  %v92_v21 = vsub.f32 %v1036_v25, %v1128_v18 }
  0x98   :  { %1843 = vst [vmem:[#allocation6_spill] sm:$0xff] %v1128_v18 }
  0x99   :  { %v1138_v26 = vpop.eup %899  ;;  %v121_v27 = vmul.f32 1.442695, %v91_v19  ;;  %v123_v24 = vmul.f32 1.442695, %v92_v21 }
  0x9a   :  { %1844 = vst [vmem:[#allocation7_spill] sm:$0xff] %v1138_v26  ;;  %v158_v20 = vsel %vm1830_vm0, %v1138_v26, 0.0  ;;  %v1142_v32 = vpop.eup %901 }
  0x9b   :  { %905 = vpow2.f32 %v121_v27  ;;  %147 = vadd.xlane.f32.xlu0 %v146_v22  ;;  %141 = vadd.xlane.f32.xlu2 %v140_v23  ;;  %v1144_v25 = vpop.eup %903  ;;  %v155_v38 = vsel %vm1830_vm0, %v1142_v32, 0.0 }
  0x9c   :  { %159 = vadd.xlane.f32.xlu1 %v158_v20  ;;  %1845 = vst [vmem:[#allocation8_spill] sm:$0xff] %v1144_v25  ;;  %907 = vpow2.f32 %v111_v29  ;;  %v149_v39 = vsel %vm1830_vm0, %v1144_v25, 0.0 }
  0x9d   :  { %909 = vpow2.f32 %v123_v24 }
  0x9e   :  { %v1146_v34 = vpop.xlane.xlu1 %66 }
  0x9f   :  { %1846 = vst [vmem:[#allocation9_spill] sm:$0xff] %v1146_v34  ;;  %v89_v35 = vsub.f32 %v1045_v28, %v1146_v34 }
  0xa1   :  { %v1154_v40 = vpop.eup %905  ;;  %v117_v44 = vmul.f32 1.442695, %v89_v35 }
  0xa2   :  { %1847 = vst [vmem:[#allocation10_spill] sm:$0xff] %v1154_v40  ;;  %v167_v43 = vsel %vm1830_vm0, %v1154_v40, 0.0  ;;  %v1158_v45 = vpop.eup %907 }
  0xa3   :  { %156 = vadd.xlane.f32.xlu0 %v155_v38  ;;  %150 = vadd.xlane.f32.xlu2 %v149_v39  ;;  %v1160_v46 = vpop.eup %909  ;;  %911 = vpow2.f32 %v117_v44  ;;  %v152_v28 = vsel %vm1830_vm0, %v1158_v45, 0.0 }
  0xa4   :  { %168 = vadd.xlane.f32.xlu1 %v167_v43  ;;  %1848 = vst [vmem:[#allocation11_spill] sm:$0xff] %v1160_v46  ;;  %v170_v47 = vsel %vm1830_vm0, %v1160_v46, 0.0 }
  0xa9   :  { %v1166_v50 = vpop.eup %911 }
  0xaa   :  { %1849 = vst [vmem:[#allocation12_spill] sm:$0xff] %v1166_v50  ;;  %v161_v52 = vsel %vm1830_vm0, %v1166_v50, 0.0 }
  0xab   :  { %153 = vadd.xlane.f32.xlu0 %v152_v28  ;;  %171 = vadd.xlane.f32.xlu2 %v170_v47 }
  0xb3   :  { %162 = vadd.xlane.f32.xlu0 %v161_v52 }
  0xf6   :  { %v133_v56 = vpop.xlane.xlu2 %132 }
  0xf7   :  { %913 = vrcp.f32 %v133_v56  ;;  %v212_v38 = vand.u32 2147483647, %v133_v56  ;;  %v214_v39 = vand.u32 2147483648, %v133_v56  ;;  %vm208_vm3 = vweird.f32 %v133_v56 }
  0xf9   :  { %vm213_vm5 = vcmp.eq.f32.partialorder %v212_v38, 8.507059e+37 }
  0xfd   :  { %v914_v61 = vpop.eup %913 }
  0xfe   :  { %v1174_v59 = vpop.xlane.xlu2 %69  ;;  %v1176_v60 = vpop.xlane.xlu0 %135  ;;  %v204_v5 = vmul.f32 %v914_v61, %v133_v56  ;;  %vm209_vm2 = vweird.f32 %v914_v61 }
  0xff   :  { %1850 = vst [vmem:[#allocation13_spill] sm:$0xff] %v1174_v59  ;;  %v90_v62 = vsub.f32 %v1073_v48, %v1174_v59  ;;  %v1180_v2 = vpop.xlane.xlu1 %129  ;;  %v229_v44 = vand.u32 2147483648, %v1176_v60  ;;  %vm1222_vm4 = vmor %vm208_vm3, %vm209_vm2  ;;  %vm223_vm10 = vweird.f32 %v1176_v60 }
 0x100   :  { %v205_v48 = vsub.f32 1.0, %v204_v5  ;;  %v199_v54 = vand.u32 2147483648, %v1180_v2  ;;  %v227_v5 = vand.u32 2147483647, %v1176_v60  ;;  %vm193_vm7 = vweird.f32 %v1180_v2 }
 0x101   :  { %v119_v4 = vmul.f32 1.442695, %v90_v62  ;;  %v1237_v7 = vor.u32 1.1754944e-38, %v229_v44  ;;  %v197_v10 = vand.u32 2147483647, %v1180_v2 }
 0x102   :  { %v206_v19 = vmul.f32 %v914_v61, %v205_v48  ;;  %vm1285_vm3 = vcmp.eq.f32.partialorder %v227_v5, 8.507059e+37 }
 0x103   :  { %915 = vpow2.f32 %v119_v4  ;;  %v215_v4 = vor.u32 1.1754944e-38, %v214_v39  ;;  %v1248_v39 = vor.u32 1.1754944e-38, %v199_v54  ;;  %vm1269_vm13 = vcmp.eq.f32.partialorder %v197_v10, 8.507059e+37 }
 0x104   :  { %917 = vrcp.f32 %v1176_v60  ;;  %v207_v29 = vadd.f32 %v914_v61, %v206_v19 }
 0x105   :  { %919 = vrcp.f32 %v1180_v2 }
 0x106   :  { %v1192_v11 = vpop.xlane.xlu2 %144  ;;  %v1194_v12 = vpop.xlane.xlu0 %126  ;;  %v211_v56 = vsel %vm1222_vm4, %v914_v61, %v207_v29 }
 0x107   :  { %921 = vrcp.f32 %v1192_v11  ;;  %v1199_v21 = vpop.xlane.xlu1 %138  ;;  %v272_v61 = vand.u32 2147483647, %v1192_v11  ;;  %v184_v29 = vand.u32 2147483648, %v1194_v12  ;;  %vm268_vm12 = vweird.f32 %v1192_v11 }
 0x108   :  { %923 = vrcp.f32 %v1194_v12  ;;  %v244_v18 = vand.u32 2147483648, %v1199_v21  ;;  %vm238_vm2 = vweird.f32 %v1199_v21 }
 0x109   :  { %v1197_v17 = vpop.eup %915  ;;  %925 = vrcp.f32 %v1199_v21  ;;  %vm1273_vm14 = vcmp.eq.f32.partialorder %v272_v61, 8.507059e+37  ;;  %v1277_v50 = vor.u32 1.1754944e-38, %v184_v29 }
 0x10a   :  { %1851 = vst [vmem:[#allocation14_spill] sm:$0xff] %v1197_v17  ;;  %v1201_v22 = vpop.eup %917  ;;  %v164_v27 = vsel %vm1830_vm0, %v1197_v17, 0.0 }
 0x10b   :  { %v1203_v23 = vpop.eup %919  ;;  %165 = vadd.xlane.f32.xlu1 %v164_v27  ;;  %v219_v24 = vmul.f32 %v1201_v22, %v1176_v60  ;;  %v274_v27 = vand.u32 2147483648, %v1192_v11  ;;  %vm224_vm11 = vweird.f32 %v1201_v22 }
 0x10c   :  { %v189_v28 = vmul.f32 %v1203_v23, %v1180_v2  ;;  %vm194_vm9 = vweird.f32 %v1203_v23 }
 0x10d   :  { %v1207_v20 = vpop.eup %921  ;;  %v220_v53 = vsub.f32 1.0, %v219_v24  ;;  %v216_v24 = vsel %vm213_vm5, %v215_v4, %v211_v56  ;;  %v275_v34 = vor.u32 1.1754944e-38, %v274_v27 }
 0x10e   :  { %v1213_v35 = vpop.xlane.xlu0 %147  ;;  %v1215_v43 = vpop.xlane.xlu2 %141  ;;  %v264_v47 = vmul.f32 %v1207_v20, %v1192_v11  ;;  %v190_v9 = vsub.f32 1.0, %v189_v28  ;;  %v217_v59 = vmul.f32 %v1066_v42, %v216_v24  ;;  %vm269_vm15 = vweird.f32 %v1207_v20 }
 0x10f   :  { %927 = vrcp.f32 %v1213_v35  ;;  %v1231_v62 = vpop.eup %923  ;;  %v1241_v19 = vpop.xlane.xlu1 %159  ;;  %v221_v38 = vmul.f32 %v1201_v22, %v220_v53  ;;  %vm1300_vm5 = vmor %vm268_vm12, %vm269_vm15  ;;  %v289_v16 = vand.u32 2147483648, %v1213_v35  ;;  %v287_v46 = vand.u32 2147483647, %v1213_v35 }
 0x110   :  { %929 = vrcp.f32 %v1215_v43  ;;  %v1234_v6 = vpop.eup %925  ;;  %v265_v48 = vsub.f32 1.0, %v264_v47  ;;  %v174_v44 = vmul.f32 %v1231_v62, %v1194_v12  ;;  %v191_v56 = vmul.f32 %v1203_v23, %v190_v9  ;;  %vm1319_vm12 = vmor %vm193_vm7, %vm194_vm9 }
 0x111   :  { %v234_v53 = vmul.f32 %v1234_v6, %v1199_v21  ;;  %931 = vrcp.f32 %v1241_v19  ;;  %v1281_v9 = vadd.f32 %v1201_v22, %v221_v38  ;;  %vm415_vm4 = vcmp.lt.f32.partialorder %v217_v59, 1e-05 }
 0x112   :  { %v266_v4 = vmul.f32 %v1207_v20, %v265_v48  ;;  %v175_v42 = vsub.f32 1.0, %v174_v44  ;;  %v192_v29 = vadd.f32 %v1203_v23, %v191_v56  ;;  %v242_v38 = vand.u32 2147483647, %v1199_v21 }
 0x113   :  { %v235_v48 = vsub.f32 1.0, %v234_v53  ;;  %v431_v44 = vsel %vm415_vm4, 0.0, %v217_v59  ;;  %v1304_v53 = vor.u32 1.1754944e-38, %v244_v18  ;;  %v259_v11 = vand.u32 2147483648, %v1215_v43 }
 0x114   :  { %v267_v24 = vadd.f32 %v1207_v20, %v266_v4  ;;  %v495_v56 = vsel %vm447_vm6, %v431_v44, 0.0  ;;  %v176_v59 = vmul.f32 %v1231_v62, %v175_v42  ;;  %v257_v1 = vand.u32 2147483647, %v1215_v43 }
 0x115   :  { %v1254_v47 = vpop.eup %927  ;;  %v511_v40 = vpack.c.bf16 %v495_v56, %v495_v56  ;;  %v236_v30 = vmul.f32 %v1234_v6, %v235_v48  ;;  %vm446_vm6 = vcmp.gt.f32.partialorder %v1059_v37, -5e+29  ;;  %vm239_vm15 = vweird.f32 %v1234_v6 }
 0x116   :  { %v1252_v28 = vpop.xlane.xlu0 %156  ;;  %v1263_v54 = vpop.eup %929  ;;  %v279_v61 = vmul.f32 %v1254_v47, %v1213_v35  ;;  %v271_v42 = vsel %vm1300_vm5, %v1207_v20, %v267_v24  ;;  %vm253_vm4 = vweird.f32 %v1215_v43  ;;  %v349_v2 = vand.u32 2147483648, %v1241_v19  ;;  %vm1406_vm9 = vmor %vm238_vm2, %vm239_vm15 }
 0x117   :  { %933 = vrcp.f32 %v1252_v28  ;;  %v249_v27 = vmul.f32 %v1263_v54, %v1215_v43  ;;  %v1296_v3 = vpop.eup %931  ;;  %869 = vmatmul.msk.bf16.vlgmr.msra.gmra.mxu2 %vm1836_vm8, %v511_v40  ;;  %vm1335_vm0 = vcmp.eq.f32.partialorder %v242_v38, 8.507059e+37  ;;  %v1346_v5 = vpop.xlane.xlu2 %150  ;;  %vm448_vm5 = vcmp.gt.f32.partialorder %v1057_v36, -5e+29  ;;  %vm1353_vm8 = vmor %vm223_vm10, %vm224_vm11 }
 0x118   :  { %v280_v44 = vsub.f32 1.0, %v279_v61  ;;  %v1339_v61 = vor.u32 1.1754944e-38, %v289_v16  ;;  %v339_v20 = vmul.f32 %v1296_v3, %v1241_v19  ;;  %v1358_v16 = vadd.f32 %v1231_v62, %v176_v59 }
 0x119   :  { %v250_v25 = vsub.f32 1.0, %v249_v27  ;;  %vm284_vm7 = vweird.f32 %v1254_v47  ;;  %v1361_v38 = vor.u32 1.1754944e-38, %v259_v11  ;;  %v196_v56 = vsel %vm1319_vm12, %v1203_v23, %v192_v29  ;;  %v525_v23 = vld [vmem:[%s1822_s1] sm:$0xf] }
 0x11a   :  { %v1368_v27 = vsel %vm1273_vm14, %v275_v34, %v271_v42  ;;  %v237_v60 = vadd.f32 %v1234_v6, %v236_v30  ;;  %v281_v13 = vmul.f32 %v1254_v47, %v280_v44  ;;  %vm1372_vm10 = vcmp.eq.f32.partialorder %v287_v46, 8.507059e+37  ;;  %v531_v34 = vld [vmem:[%s1822_s1 + $0x18] sm:$0xf] }
 0x11b   :  { %v251_v59 = vmul.f32 %v1263_v54, %v250_v25  ;;  %vm1377_vm11 = vcmp.eq.f32.partialorder %v257_v1, 8.507059e+37  ;;  %vm254_vm14 = vweird.f32 %v1263_v54  ;;  %v1390_v46 = vor.u32 1.1754944e-38, %v349_v2 }
 0x11c   :  { %935 = vrcp.f32 %v1346_v5  ;;  %v201_v1 = vsel %vm1269_vm13, %v1248_v39, %v196_v56  ;;  %v1872_v25 = vand.u32 2147483647, %v1194_v12  ;;  %v340_v30 = vsub.f32 1.0, %v339_v20  ;;  %vm1442_vm15 = vmor %vm253_vm4, %vm254_vm14 }
 0x11d   :  { %v1310_v4 = vpop.eup %933  ;;  %v202_v42 = vmul.f32 %v1090_v58, %v201_v1  ;;  %v226_v17 = vsel %vm1353_vm8, %v1201_v22, %v1281_v9  ;;  %v547_v2 = vsel %vm545_vm1, %v525_v23, 0  ;;  %v661_v21 = vsel %vm545_vm1, %v531_v34, 0 }
 0x11e   :  { %v324_v24 = vmul.f32 %v1310_v4, %v1252_v28  ;;  %v1387_v52 = vpop.xlane.xlu0 %153  ;;  %vm1398_vm12 = vcmp.eq.f32.partialorder %v1872_v25, 8.507059e+37  ;;  %v231_v39 = vsel %vm1285_vm3, %v1237_v7, %v226_v17  ;;  %v282_v20 = vadd.f32 %v1254_v47, %v281_v13  ;;  %v1432_v7 = vpop.xlane.xlu1 %168  ;;  %556 = vmatpush.bf16.msra.mxu0 %v547_v2  ;;  %670 = vmatpush.bf16.msrb.mxu2 %v661_v21 }
 0x11f   :  { %937 = vrcp.f32 %v1387_v52  ;;  %vm1877_vm13 = vweird.f32 %v1213_v35  ;;  %v252_v22 = vadd.f32 %v1263_v54, %v251_v59  ;;  %vm343_vm8 = vweird.f32 %v1241_v19 }
 0x120   :  { %v325_v44 = vsub.f32 1.0, %v324_v24  ;;  %vm1426_vm2 = vmor %vm1877_vm13, %vm284_vm7  ;;  %vm414_vm3 = vcmp.lt.f32.partialorder %v202_v42, 1e-05  ;;  %v232_v9 = vmul.f32 %v1086_v55, %v231_v39  ;;  %v241_v13 = vsel %vm1406_vm9, %v1234_v6, %v237_v60 }
 0x121   :  { %vm328_vm7 = vweird.f32 %v1252_v28  ;;  %v332_v10 = vand.u32 2147483647, %v1252_v28  ;;  %v430_v24 = vsel %vm414_vm3, 0.0, %v202_v42  ;;  %v334_v40 = vand.u32 2147483648, %v1252_v28  ;;  %v532_v28 = vld [vmem:[%s1822_s1 + $0x1c] sm:$0xf] }
 0x122   :  { %v326_v55 = vmul.f32 %v1310_v4, %v325_v44  ;;  %v494_v6 = vsel %vm446_vm6, %v430_v24, 0.0  ;;  %vm416_vm9 = vcmp.lt.f32.partialorder %v232_v9, 1e-05  ;;  %v1452_v56 = vpop.eup %935  ;;  %v341_v43 = vmul.f32 %v1296_v3, %v340_v30  ;;  %v530_v44 = vld [vmem:[%s1822_s1 + $0x14] sm:$0xf] }
 0x123   :  { %939 = vrcp.f32 %v1432_v7  ;;  %v510_v60 = vpack.c.bf16 %v494_v6, %v494_v6  ;;  %v432_v59 = vsel %vm416_vm9, 0.0, %v232_v9  ;;  %v286_v23 = vsel %vm1426_vm2, %v1254_v47, %v282_v20  ;;  %v534_v20 = vld [vmem:[%s1822_s1 + $0x24] sm:$0xf] }
 0x124   :  { %v256_v34 = vsel %vm1442_vm15, %v1263_v54, %v252_v22  ;;  %vm329_vm4 = vweird.f32 %v1310_v4  ;;  %v496_v37 = vsel %vm448_vm5, %v432_v59, 0.0  ;;  %vm445_vm6 = vcmp.gt.f32.partialorder %v1051_v31, -5e+29 }
 0x125   :  { %v1465_v1 = vpop.eup %937  ;;  %vm451_vm14 = vcmp.gt.f32.partialorder %v1054_v33, -5e+29  ;;  %vm1882_vm13 = vweird.f32 %v1231_v62  ;;  %vm1883_vm3 = vweird.f32 %v1194_v12  ;;  %v1480_v54 = vsel %vm1335_vm0, %v1304_v53, %v241_v13  ;;  %v1493_v53 = vpop.xlane.xlu2 %171 }
 0x126   :  { %vm1473_vm2 = vmor %vm1883_vm3, %vm1882_vm13  ;;  %vm344_vm5 = vweird.f32 %v1296_v3  ;;  %vm1483_vm15 = vcmp.eq.f32.partialorder %v332_v10, 8.507059e+37  ;;  %vm1888_vm9 = vcmask 64512   ;;  %v512_v25 = vpack.c.bf16 %v496_v37, %v496_v37 }
 0x127   :  { %868 = vmatmul.msk.bf16.vlgmr.msra.gmra.mxu1 %vm1888_vm9, %v510_v60  ;;  %v327_v12 = vadd.f32 %v1310_v4, %v326_v55  ;;  %v335_v18 = vor.u32 1.1754944e-38, %v334_v40  ;;  %v294_v30 = vmul.f32 %v1452_v56, %v1346_v5  ;;  %v309_v48 = vmul.f32 %v1465_v1, %v1387_v52  ;;  %vm1515_vm13 = vmor %vm328_vm7, %vm329_vm4 }
 0x128   :  { %v291_v42 = vsel %vm1372_vm10, %v1339_v61, %v286_v23  ;;  %v261_v17 = vsel %vm1377_vm11, %v1361_v38, %v256_v34  ;;  %v342_v39 = vadd.f32 %v1296_v3, %v341_v43  ;;  %v1889_v2 = vand.u32 2147483647, %v1241_v19  ;;  %vm1894_vm10 = vmmov %vm1888_vm9  ;;  %v535_v23 = vld [vmem:[%s1822_s1 + $0x28] sm:$0xf]  ;;  %v537_v43 = vld [vmem:[%s1822_s1 + $0x30] sm:$0xf] }
 0x129   :  { %v302_v26 = vand.u32 2147483647, %v1346_v5  ;;  %870 = vmatmul.msk.bf16.vlgmr.msra.gmra.mxu3 %vm1894_vm10, %v512_v25  ;;  %v304_v61 = vand.u32 2147483648, %v1346_v5  ;;  %v310_v38 = vsub.f32 1.0, %v309_v48  ;;  %v181_v11 = vsel %vm1473_vm2, %v1231_v62, %v1358_v16  ;;  %v1531_v22 = vpop.eup %939  ;;  %vm1548_vm11 = vmor %vm343_vm8, %vm344_vm5 }
 0x12a   :  { %vm1507_vm0 = vcmp.eq.f32.partialorder %v1889_v2, 8.507059e+37  ;;  %v277_v58 = vmul.f32 %v1098_v0, %v1368_v27  ;;  %v392_v9 = vand.u32 2147483647, %v1432_v7  ;;  %941 = vrcp.f32 %v1493_v53 }
 0x12b   :  { %v186_v13 = vsel %vm1398_vm12, %v1277_v50, %v181_v11  ;;  %v642_v35 = vsel %vm545_vm1, %v530_v44, 0  ;;  %v331_v0 = vsel %vm1515_vm13, %v1310_v4, %v327_v12  ;;  %v295_v62 = vsub.f32 1.0, %v294_v30  ;;  %v1595_v30 = vpop.xlane.xlu0 %162 }
 0x12c   :  { %v311_v27 = vmul.f32 %v1465_v1, %v310_v38  ;;  %v187_v16 = vmul.f32 %v1096_v63, %v186_v13  ;;  %651 = vmatpush.bf16.msrb.mxu1 %v642_v35  ;;  %vm313_vm12 = vweird.f32 %v1387_v52  ;;  %vm314_vm7 = vweird.f32 %v1465_v1 }
 0x12d   :  { %vm419_vm4 = vcmp.lt.f32.partialorder %v277_v58, 1e-05  ;;  %v680_v50 = vsel %vm545_vm1, %v532_v28, 0  ;;  %vm452_vm3 = vcmp.gt.f32.partialorder %v1064_v41, -5e+29  ;;  %vm298_vm9 = vweird.f32 %v1346_v5  ;;  %vm1572_vm13 = vmor %vm313_vm12, %vm314_vm7 }
 0x12e   :  { %vm450_vm2 = vcmp.gt.f32.partialorder %v1079_v51, -5e+29  ;;  %v384_v63 = vmul.f32 %v1531_v22, %v1432_v7  ;;  %v317_v19 = vand.u32 2147483647, %v1387_v52  ;;  %v319_v4 = vand.u32 2147483648, %v1387_v52  ;;  %689 = vmatpush.bf16.msrb.mxu3 %v680_v50 }
 0x12f   :  { %vm413_vm8 = vcmp.lt.f32.partialorder %v187_v16, 1e-05  ;;  %v394_v29 = vand.u32 2147483648, %v1432_v7  ;;  %v312_v24 = vadd.f32 %v1465_v1, %v311_v27  ;;  %v435_v40 = vsel %vm419_vm4, 0.0, %v277_v58  ;;  %v533_v27 = vld [vmem:[%s1822_s1 + $0x20] sm:$0xf] }
 0x130   :  { %v429_v55 = vsel %vm413_vm8, 0.0, %v187_v16  ;;  %v346_v6 = vsel %vm1548_vm11, %v1296_v3, %v342_v39  ;;  %vm388_vm5 = vweird.f32 %v1432_v7  ;;  %v499_v59 = vsel %vm451_vm14, %v435_v40, 0.0  ;;  %v529_v3 = vld [vmem:[%s1822_s1 + $0x10] sm:$0xf]  ;;  %v1586_v34 = vpop.eup %941  ;;  %vm1901_vm14 = vmmov %vm1894_vm10  ;;  %v540_v40 = vld [vmem:[%s1822_s1 + $0x3c] sm:$0xf] }
 0x131   :  { %v493_v60 = vsel %vm445_vm6, %v429_v55, 0.0  ;;  %v336_v52 = vsel %vm1483_vm15, %v335_v18, %v331_v0  ;;  %v296_v37 = vmul.f32 %v1452_v56, %v295_v62  ;;  %v515_v47 = vpack.c.bf16 %v499_v59, %v499_v59  ;;  %vm1902_vm15 = vmmov %vm1894_vm10 }
 0x132   :  { %v509_v31 = vpack.c.bf16 %v493_v60, %v493_v60  ;;  %v385_v25 = vsub.f32 1.0, %v384_v63  ;;  %vm1591_vm6 = vcmp.eq.f32.partialorder %v317_v19, 8.507059e+37  ;;  %v320_v12 = vor.u32 1.1754944e-38, %v319_v4 }
 0x133   :  { %v262_v48 = vmul.f32 %v1122_v15, %v261_v17  ;;  %v316_v44 = vsel %vm1572_vm13, %v1465_v1, %v312_v24  ;;  %873 = vmatmul.msk.bf16.vlgmr.msrb.gmra.mxu2 %vm1902_vm15, %v515_v47  ;;  %v292_v36 = vmul.f32 %v1120_v14, %v291_v42  ;;  %v623_v18 = vsel %vm545_vm1, %v529_v3, 0 }
 0x134   :  { %867 = vmatmul.msk.bf16.vlgmr.msra.gmra.mxu0 %vm1901_vm14, %v509_v31  ;;  %v737_v39 = vsel %vm545_vm1, %v535_v23, 0  ;;  %v351_v2 = vsel %vm1507_vm0, %v1390_v46, %v346_v6  ;;  %vm299_vm10 = vweird.f32 %v1452_v56  ;;  %v399_v15 = vmul.f32 %v1586_v34, %v1493_v53 }
 0x135   :  { %632 = vmatpush.bf16.msrb.mxu0 %v623_v18  ;;  %746 = vmatpush.bf16.msra.mxu2 %v737_v39  ;;  %v247_v1 = vmul.f32 %v1114_v8, %v1480_v54  ;;  %vm449_vm11 = vcmp.gt.f32.partialorder %v1075_v49, -5e+29  ;;  %v337_v14 = vmul.f32 %v1142_v32, %v336_v52  ;;  %943 = vrcp.f32 %v1595_v30  ;;  %v536_v8 = vld [vmem:[%s1822_s1 + $0x2c] sm:$0xf]  ;;  %vm1636_vm8 = vmor %vm298_vm9, %vm299_vm10  ;;  %v1920_v18 = vld [vmem:[#allocation8_spill] sm:$0xff] }
 0x136   :  { %vm418_vm12 = vcmp.lt.f32.partialorder %v262_v48, 1e-05  ;;  %vm420_vm7 = vcmp.lt.f32.partialorder %v292_v36, 1e-05  ;;  %v386_v46 = vmul.f32 %v1531_v22, %v385_v25  ;;  %v321_v42 = vsel %vm1591_vm6, %v320_v12, %v316_v44  ;;  %v1914_v25 = vld [vmem:[#allocation4_spill] sm:$0xff] }
 0x137   :  { %v434_v17 = vsel %vm418_vm12, 0.0, %v262_v48  ;;  %v436_v21 = vsel %vm420_vm7, 0.0, %v292_v36  ;;  %v297_v32 = vadd.f32 %v1452_v56, %v296_v37  ;;  %vm389_vm0 = vweird.f32 %v1531_v22  ;;  %v1919_v36 = vld [vmem:[#allocation2_spill] sm:$0xff] }
 0x138   :  { %v498_v54 = vsel %vm450_vm2, %v434_v17, 0.0  ;;  %v500_v38 = vsel %vm452_vm3, %v436_v21, 0.0  ;;  %v400_v11 = vsub.f32 1.0, %v399_v15  ;;  %vm417_vm4 = vcmp.lt.f32.partialorder %v247_v1, 1e-05  ;;  %vm1905_vm2 = vmmov %vm1901_vm14 }
 0x139   :  { %v514_v58 = vpack.c.bf16 %v498_v54, %v498_v54  ;;  %v516_v28 = vpack.c.bf16 %v500_v38, %v500_v38  ;;  %v322_v35 = vmul.f32 %v1158_v45, %v321_v42  ;;  %vm423_vm13 = vcmp.lt.f32.partialorder %v337_v14, 1e-05  ;;  %vm1906_vm6 = vmmov %vm1905_vm2  ;;  %v1907_v45 = vld [vmem:[#allocation7_spill] sm:$0xff] }
 0x13a   :  { %v718_v51 = vsel %vm545_vm1, %v534_v20, 0  ;;  %v756_v41 = vsel %vm545_vm1, %v536_v8, 0  ;;  %vm455_vm3 = vcmp.gt.f32.partialorder %v1088_v57, -5e+29  ;;  %v387_v0 = vadd.f32 %v1531_v22, %v386_v46  ;;  %vm1665_vm14 = vmor %vm388_vm5, %vm389_vm0 }
 0x13b   :  { %872 = vmatmul.msk.bf16.vlgmr.msrb.gmra.mxu1 %vm1905_vm2, %v514_v58  ;;  %874 = vmatmul.msk.bf16.vlgmr.msrb.gmra.mxu3 %vm1906_vm6, %v516_v28  ;;  %v439_v62 = vsel %vm423_vm13, 0.0, %v337_v14  ;;  %v1650_v16 = vpop.eup %943  ;;  %v352_v10 = vmul.f32 %v1907_v45, %v351_v2  ;;  %vm1655_vm9 = vcmp.eq.f32.partialorder %v302_v26, 8.507059e+37  ;;  %v305_v63 = vor.u32 1.1754944e-38, %v304_v61  ;;  %v539_v26 = vld [vmem:[%s1822_s1 + $0x38] sm:$0xf]  ;;  %v1921_v2 = vld [vmem:[#allocation10_spill] sm:$0xff] }
 0x13c   :  { %v433_v4 = vsel %vm417_vm4, 0.0, %v247_v1  ;;  %727 = vmatpush.bf16.msra.mxu1 %v718_v51  ;;  %765 = vmatpush.bf16.msra.mxu3 %v756_v41  ;;  %v301_v5 = vsel %vm1636_vm8, %v1452_v56, %v297_v32  ;;  %vm1678_vm15 = vcmp.eq.f32.partialorder %v392_v9, 8.507059e+37  ;;  %v395_v24 = vor.u32 1.1754944e-38, %v394_v29  ;;  %vm1917_vm4 = vmmov %vm1905_vm2  ;;  %v1925_v58 = vld [vmem:[#allocation5_spill] sm:$0xff]  ;;  %v1926_v28 = vld [vmem:[#allocation3_spill] sm:$0xff] }
 0x13d   :  { %v503_v55 = vsel %vm455_vm3, %v439_v62, 0.0  ;;  %v401_v6 = vmul.f32 %v1586_v34, %v400_v11  ;;  %vm403_vm5 = vweird.f32 %v1493_v53  ;;  %vm422_vm10 = vcmp.lt.f32.partialorder %v322_v35, 1e-05  ;;  %vm1918_vm8 = vmmov %vm1905_vm2  ;;  %v1928_v45 = vld [vmem:[#allocation6_spill] sm:$0xff]  ;;  %v538_v61 = vld [vmem:[%s1822_s1 + $0x34] sm:$0xf] }
 0x13e   :  { %v699_v56 = vsel %vm545_vm1, %v533_v27, 0  ;;  %v391_v9 = vsel %vm1665_vm14, %v1531_v22, %v387_v0  ;;  %v354_v7 = vmul.f32 %v1650_v16, %v1595_v30  ;;  %v497_v57 = vsel %vm449_vm11, %v433_v4, 0.0  ;;  %v1931_v4 = vld [vmem:[#allocation9_spill] sm:$0xff] }
 0x13f   :  { %708 = vmatpush.bf16.msra.mxu0 %v699_v56  ;;  %v813_v29 = vsel %vm545_vm1, %v539_v26, 0  ;;  %vm404_vm12 = vweird.f32 %v1586_v34  ;;  %v519_v60 = vpack.c.bf16 %v503_v55, %v503_v55  ;;  %vm424_vm7 = vcmp.lt.f32.partialorder %v352_v10, 1e-05 }
 0x140   :  { %822 = vmatpush.bf16.msrb.mxu2 %v813_v29  ;;  %v832_v22 = vsel %vm545_vm1, %v540_v40, 0  ;;  %v306_v59 = vsel %vm1655_vm9, %v305_v63, %v301_v5  ;;  %v407_v49 = vand.u32 2147483647, %v1493_v53  ;;  %v409_v3 = vand.u32 2147483648, %v1493_v53  ;;  %vm1719_vm0 = vmor %vm403_vm5, %vm404_vm12 }
 0x141   :  { %v438_v23 = vsel %vm422_vm10, 0.0, %v322_v35  ;;  %841 = vmatpush.bf16.msrb.mxu3 %v832_v22  ;;  %v396_v52 = vsel %vm1678_vm15, %v395_v24, %v391_v9  ;;  %v402_v37 = vadd.f32 %v1586_v34, %v401_v6  ;;  %v513_v31 = vpack.c.bf16 %v497_v57, %v497_v57  ;;  %vm1922_vm15 = vmmov %vm1917_vm4 }
 0x142   :  { %v775_v47 = vsel %vm545_vm1, %v537_v43, 0  ;;  %vm454_vm11 = vcmp.gt.f32.partialorder %v1914_v25, -5e+29  ;;  %v355_v12 = vsub.f32 1.0, %v354_v7  ;;  %v440_v48 = vsel %vm424_vm7, 0.0, %v352_v10  ;;  %vm1923_vm5 = vmmov %vm1917_vm4  ;;  %v1929_v10 = vld [vmem:[#allocation12_spill] sm:$0xff] }
 0x143   :  { %877 = vmatmul.msk.bf16.vlgmr.msra.gmra.mxu2 %vm1918_vm8, %v519_v60  ;;  %v502_v44 = vsel %vm454_vm11, %v438_v23, 0.0  ;;  %vm456_vm13 = vcmp.gt.f32.partialorder %v1919_v36, -5e+29  ;;  %v307_v39 = vmul.f32 %v1920_v18, %v306_v59  ;;  %v397_v15 = vmul.f32 %v1921_v2, %v396_v52  ;;  %vm1927_vm8 = vmmov %vm1917_vm4  ;;  %v1933_v59 = vld [vmem:[#allocation14_spill] sm:$0xff] }
 0x144   :  { %871 = vmatmul.msk.bf16.vlgmr.msrb.gmra.mxu0 %vm1917_vm4, %v513_v31  ;;  %v410_v1 = vor.u32 1.1754944e-38, %v409_v3  ;;  %v406_v53 = vsel %vm1719_vm0, %v1586_v34, %v402_v37  ;;  %vm408_vm3 = vcmp.eq.f32.partialorder %v407_v49, 8.507059e+37  ;;  %v504_v14 = vsel %vm456_vm13, %v440_v48, 0.0  ;;  %v1924_v34 = vld [vmem:[#allocation11_spill] sm:$0xff]  ;;  %v1934_v3 = vld [vmem:[#allocation13_spill] sm:$0xff] }
 0x145   :  { %784 = vmatpush.bf16.msrb.mxu0 %v775_v47  ;;  %v356_v46 = vmul.f32 %v1650_v16, %v355_v12  ;;  %v518_v42 = vpack.c.bf16 %v502_v44, %v502_v44  ;;  %vm358_vm2 = vweird.f32 %v1595_v30  ;;  %vm359_vm6 = vweird.f32 %v1650_v16 }
 0x146   :  { %v411_v17 = vsel %vm408_vm3, %v410_v1, %v406_v53  ;;  %v520_v21 = vpack.c.bf16 %v504_v14, %v504_v14  ;;  %vm421_vm9 = vcmp.lt.f32.partialorder %v307_v39, 1e-05  ;;  %vm427_vm14 = vcmp.lt.f32.partialorder %v397_v15, 1e-05  ;;  %vm360_vm10 = vmor %vm358_vm2, %vm359_vm6 }
 0x147   :  { %v364_v20 = vand.u32 2147483648, %v1595_v30  ;;  %v357_v8 = vadd.f32 %v1650_v16, %v356_v46  ;;  %v362_v32 = vand.u32 2147483647, %v1595_v30  ;;  %v412_v54 = vmul.f32 %v1924_v34, %v411_v17  ;;  %vm1930_vm2 = vmmov %vm1917_vm4 }
 0x148   :  { %v437_v38 = vsel %vm421_vm9, 0.0, %v307_v39  ;;  %v443_v11 = vsel %vm427_vm14, 0.0, %v397_v15  ;;  %vm459_vm12 = vcmp.gt.f32.partialorder %v1925_v58, -5e+29  ;;  %vm453_vm7 = vcmp.gt.f32.partialorder %v1926_v28, -5e+29  ;;  %vm1932_vm9 = vmmov %vm1930_vm2 }
 0x149   :  { %v365_v13 = vor.u32 1.1754944e-38, %v364_v20  ;;  %v361_v35 = vsel %vm360_vm10, %v1650_v16, %v357_v8  ;;  %vm363_vm11 = vcmp.eq.f32.partialorder %v362_v32, 8.507059e+37  ;;  %v501_v51 = vsel %vm453_vm7, %v437_v38, 0.0  ;;  %vm1935_vm7 = vmmov %vm1930_vm2 }
 0x14a   :  { %v507_v41 = vsel %vm459_vm12, %v443_v11, 0.0  ;;  %vm428_vm0 = vcmp.lt.f32.partialorder %v412_v54, 1e-05  ;;  %v517_v0 = vpack.c.bf16 %v501_v51, %v501_v51  ;;  %vm460_vm13 = vcmp.gt.f32.partialorder %v1928_v45, -5e+29 }
 0x14b   :  { %876 = vmatmul.msk.bf16.vlgmr.msra.gmra.mxu1 %vm1922_vm15, %v518_v42  ;;  %878 = vmatmul.msk.bf16.vlgmr.msra.gmra.mxu3 %vm1923_vm5, %v520_v21  ;;  %v366_v30 = vsel %vm363_vm11, %v365_v13, %v361_v35  ;;  %v523_v62 = vpack.c.bf16 %v507_v41, %v507_v41  ;;  %v444_v27 = vsel %vm428_vm0, 0.0, %v412_v54  ;;  %vm457_vm6 = vcmp.gt.f32.partialorder %v1931_v4, -5e+29 }
 0x14c   :  { %v367_v50 = vmul.f32 %v1929_v10, %v366_v30  ;;  %v508_v63 = vsel %vm460_vm13, %v444_v27, 0.0  ;;  %v794_v24 = vsel %vm545_vm1, %v538_v61, 0  ;;  %vm458_vm12 = vcmp.gt.f32.partialorder %v1934_v3, -5e+29 }
 0x14d   :  { %v524_v19 = vpack.c.bf16 %v508_v63, %v508_v63  ;;  %803 = vmatpush.bf16.msrb.mxu1 %v794_v24  ;;  %vm1936_vm11 = vcmask 60416  }
 0x14e   :  { %vm425_vm3 = vcmp.lt.f32.partialorder %v367_v50, 1e-05  ;;  %vm1937_vm0 = vmmov %vm1936_vm11 }
 0x14f   :  { %v441_v16 = vsel %vm425_vm3, 0.0, %v367_v50  ;;  %vm1940_vm13 = vmmov %vm1937_vm0 }
 0x150   :  { %v505_v26 = vsel %vm457_vm6, %v441_v16, 0.0  ;;  %vm1941_vm3 = vmmov %vm1937_vm0 }
 0x151   :  { %v521_v5 = vpack.c.bf16 %v505_v26, %v505_v26  ;;  %vm1943_vm6 = vmmov %vm1937_vm0 }
 0x153   :  { %881 = vmatmul.msk.bf16.vlgmr.msrb.gmra.mxu2 %vm1927_vm8, %v523_v62  ;;  %vm1939_vm8 = vmmov %vm1937_vm0 }
 0x154   :  { %875 = vmatmul.msk.bf16.vlgmr.msra.gmra.mxu0 %vm1917_vm4, %v517_v0  ;;  %vm1938_vm4 = vmmov %vm1937_vm0 }
 0x15b   :  { %882 = vmatmul.msk.bf16.vlgmr.msrb.gmra.mxu3 %vm1930_vm2, %v524_v19  ;;  %vm1942_vm2 = vmmov %vm1937_vm0 }
 0x164   :  { %879 = vmatmul.msk.bf16.vlgmr.msrb.gmra.mxu0 %vm1932_vm9, %v521_v5  ;;  %vm1944_vm9 = vmmov %vm1937_vm0 }
 0x17e   :  { %v166_v55 = vpop.xlane.xlu1 %165 }
 0x17f   :  { %945 = vrcp.f32 %v166_v55  ;;  %v379_v9 = vand.u32 2147483648, %v166_v55  ;;  %v377_v57 = vand.u32 2147483647, %v166_v55  ;;  %vm373_vm15 = vweird.f32 %v166_v55 }
 0x181   :  { %v380_v43 = vor.u32 1.1754944e-38, %v379_v9  ;;  %vm378_vm10 = vcmp.eq.f32.partialorder %v377_v57, 8.507059e+37 }
 0x185   :  { %v946_v40 = vpop.eup %945 }
 0x186   :  { %v369_v6 = vmul.f32 %v946_v40, %v166_v55  ;;  %vm374_vm14 = vweird.f32 %v946_v40 }
 0x187   :  { %vm375_vm5 = vmor %vm373_vm15, %vm374_vm14 }
 0x188   :  { %v370_v56 = vsub.f32 1.0, %v369_v6  ;;  %vm1945_vm14 = vmmov %vm1937_vm0 }
 0x189   :  { %vm1946_vm15 = vmmov %vm1937_vm0 }
 0x18a   :  { %v371_v7 = vmul.f32 %v946_v40, %v370_v56 }
 0x18c   :  { %v372_v29 = vadd.f32 %v946_v40, %v371_v7 }
 0x18e   :  { %v376_v60 = vsel %vm375_vm5, %v946_v40, %v372_v29  ;;  %vm1947_vm5 = vmmov %vm1937_vm0 }
 0x18f   :  { %v381_v22 = vsel %vm378_vm10, %v380_v43, %v376_v60  ;;  %vm1948_vm10 = vmmov %vm1937_vm0 }
 0x190   :  { %v382_v49 = vmul.f32 %v1933_v59, %v381_v22 }
 0x192   :  { %vm426_vm1 = vcmp.lt.f32.partialorder %v382_v49, 1e-05 }
 0x193   :  { %v442_v23 = vsel %vm426_vm1, 0.0, %v382_v49  ;;  %vm1949_vm1 = vmmov %vm1937_vm0 }
 0x194   :  { %v506_v52 = vsel %vm458_vm12, %v442_v23, 0.0  ;;  %vm1950_vm12 = vmmov %vm1937_vm0 }
 0x195   :  { %v522_v37 = vpack.c.bf16 %v506_v52, %v506_v52 }
 0x197   :  { %880 = vmatmul.msk.bf16.vlgmr.msrb.gmra.mxu1 %vm1935_vm7, %v522_v37  ;;  %vm1951_vm7 = vmmov %vm1937_vm0 }
 0x19a   :  { %v596_v31 = vpop.f32.mrf.mxu2 }
 0x19b   :  { %849 = vst.msk [vmem:[%s1823_s2 + $0x8] sm:$0xf] %vm1936_vm11, %v596_v31 }
 0x1a2   :  { %v598_v25 = vpop.f32.mrf.mxu2 }
 0x1a4   :  { %v577_v47 = vpop.f32.mrf.mxu1 }
 0x1a5   :  { %848 = vst.msk [vmem:[%s1823_s2 + $0x4] sm:$0xf] %vm1937_vm0, %v577_v47 }
 0x1ac   :  { %v615_v33 = vpop.f32.mrf.mxu3  ;;  %v579_v12 = vpop.f32.mrf.mxu1 }
 0x1ad   :  { %850 = vst.msk [vmem:[%s1823_s2 + $0xc] sm:$0xf] %vm1938_vm4, %v615_v33 }
 0x1b1   :  { %v558_v48 = vpop.f32.mrf.mxu0 }
 0x1b2   :  { %847 = vst.msk [vmem:[%s1823_s2] sm:$0xf] %vm1939_vm8, %v558_v48 }
 0x1b4   :  { %v617_v44 = vpop.f32.mrf.mxu3 }
 0x1b6   :  { %v672_v36 = vpop.f32.mrf.mxu2 }
 0x1b7   :  { %853 = vst.msk [vmem:[%s1823_s2 + $0x18] sm:$0xf] %vm1940_vm13, %v672_v36 }
 0x1b8   :  { %v653_v18 = vpop.f32.mrf.mxu1 }
 0x1b9   :  { %v560_v39 = vpop.f32.mrf.mxu0  ;;  %852 = vst.msk [vmem:[%s1823_s2 + $0x14] sm:$0xf] %vm1941_vm3, %v653_v18 }
 0x1be   :  { %v691_v2 = vpop.f32.mrf.mxu3  ;;  %v674_v15 = vpop.f32.mrf.mxu2 }
 0x1bf   :  { %854 = vst.msk [vmem:[%s1823_s2 + $0x1c] sm:$0xf] %vm1942_vm2, %v691_v2 }
 0x1c0   :  { %v655_v1 = vpop.f32.mrf.mxu1 }
 0x1c1   :  { %v634_v53 = vpop.f32.mrf.mxu0 }
 0x1c2   :  { %851 = vst.msk [vmem:[%s1823_s2 + $0x10] sm:$0xf] %vm1943_vm6, %v634_v53 }
 0x1c6   :  { %v693_v14 = vpop.f32.mrf.mxu3  ;;  %v748_v46 = vpop.f32.mrf.mxu2 }
 0x1c7   :  { %857 = vst.msk [vmem:[%s1823_s2 + $0x28] sm:$0xf] %vm1944_vm9, %v748_v46 }
 0x1c8   :  { %v729_v42 = vpop.f32.mrf.mxu1 }
 0x1c9   :  { %v636_v17 = vpop.f32.mrf.mxu0  ;;  %856 = vst.msk [vmem:[%s1823_s2 + $0x24] sm:$0xf] %vm1945_vm14, %v729_v42 }
 0x1ce   :  { %v767_v21 = vpop.f32.mrf.mxu3  ;;  %v750_v20 = vpop.f32.mrf.mxu2 }
 0x1cf   :  { %858 = vst.msk [vmem:[%s1823_s2 + $0x2c] sm:$0xf] %vm1946_vm15, %v767_v21 }
 0x1d0   :  { %v731_v8 = vpop.f32.mrf.mxu1 }
 0x1d1   :  { %v710_v32 = vpop.f32.mrf.mxu0 }
 0x1d2   :  { %855 = vst.msk [vmem:[%s1823_s2 + $0x20] sm:$0xf] %vm1947_vm5, %v710_v32 }
 0x1d6   :  { %v769_v34 = vpop.f32.mrf.mxu3  ;;  %v824_v54 = vpop.f32.mrf.mxu2 }
 0x1d7   :  { %861 = vst.msk [vmem:[%s1823_s2 + $0x38] sm:$0xf] %vm1948_vm10, %v824_v54 }
 0x1d9   :  { %v712_v38 = vpop.f32.mrf.mxu0 }
 0x1de   :  { %v843_v11 = vpop.f32.mrf.mxu3  ;;  %v826_v58 = vpop.f32.mrf.mxu2 }
 0x1df   :  { %862 = vst.msk [vmem:[%s1823_s2 + $0x3c] sm:$0xf] %vm1949_vm1, %v843_v11 }
 0x1e1   :  { %v786_v28 = vpop.f32.mrf.mxu0 }
 0x1e2   :  { %859 = vst.msk [vmem:[%s1823_s2 + $0x30] sm:$0xf] %vm1950_vm12, %v786_v28 }
 0x1e6   :  { %v845_v13 = vpop.f32.mrf.mxu3 }
 0x1e9   :  { %v788_v35 = vpop.f32.mrf.mxu0 }
 0x214   :  { %v805_v51 = vpop.f32.mrf.mxu1 }
 0x215   :  { %860 = vst.msk [vmem:[%s1823_s2 + $0x34] sm:$0xf] %vm1951_vm7, %v805_v51 }
 0x21c   :  { %v807_v41 = vpop.f32.mrf.mxu1 }

</bundles_post_ra>
